<compile_context>
chip_gen: v6e
topology: v6e:2x2x1
jax: 0.10.0
libtpu: 0.0.40
codegen_flags: <defaults>
</compile_context>

<pallas_src>
import numpy as np
import jax
import jax.numpy as jnp
from jax.experimental import pallas as pl
from jax.experimental.pallas import tpu as pltpu

TM = 512        # voxel-row tile (big tile -> near-roofline DMA, still tiny VMEM footprint)
TR = 64         # loss-reduction row tile (64 x 128 = 8192 elements / grid step)
TSDF_LANE = 126 # lane carrying the packed tsdf logit in the voxel-head output slab
OCC_LANE = 127  # lane carrying the packed occ  logit in the voxel-head output slab


def _next_pow2(n):
    n = int(n)
    return 1 if n <= 1 else 1 << (n - 1).bit_length()


# ---------------------------------------------------------------------------
# Pallas kernels
# ---------------------------------------------------------------------------
def _voxel_head_kernel(x_ref, w1_ref, b1_ref, w2_ref, b2_ref, wh_ref, bh_ref,
                       out_ref):
    # Per-voxel MLP (SPVCNN point-transform stand-in) + fused tsdf/occ heads.
    # All matmul operands are bf16 (native MXU dtype), accumulation in f32.
    x = x_ref[...]                                                     # bf16 (TM, Cin_pad)
    h = jnp.dot(x, w1_ref[...], preferred_element_type=jnp.float32) + b1_ref[...]
    h = jnp.maximum(h, 0.0)
    f = jnp.dot(h.astype(jnp.bfloat16), w2_ref[...],
                preferred_element_type=jnp.float32) + b2_ref[...]
    f = jnp.maximum(f, 0.0)                                            # lanes >= cout are 0
    heads = jnp.dot(f.astype(jnp.bfloat16), wh_ref[...],
                    preferred_element_type=jnp.float32) + bh_ref[...]  # only lanes 126/127 nonzero
    # Pack: out[:, :cout] = feat, out[:, 126] = tsdf, out[:, 127] = occ.
    out_ref[...] = f + heads


def voxel_head(feat, params):
    """feat: (N, Cin) f32 -> (N, 128) f32 slab:
       lanes [:cout] = point features, lane 126 = tsdf logit, lane 127 = occ logit."""
    w1, b1, w2, b2, wh, bh = params
    N, Cin = feat.shape
    Cin_pad = w1.shape[0]
    n_tiles = _next_pow2(pl.cdiv(N, TM))          # bucket -> few distinct compiled shapes
    N_pad = n_tiles * TM
    x = jnp.pad(feat.astype(jnp.bfloat16), ((0, N_pad - N), (0, Cin_pad - Cin)))
    out = pl.pallas_call(
        _voxel_head_kernel,
        out_shape=jax.ShapeDtypeStruct((N_pad, 128), jnp.float32),
        grid_spec=pltpu.PrefetchScalarGridSpec(
            num_scalar_prefetch=0, grid=(n_tiles,),
            in_specs=[pl.BlockSpec((TM, Cin_pad), lambda i: (i, 0)),
                      pl.BlockSpec((Cin_pad, 128), lambda i: (0, 0)),
                      pl.BlockSpec((1, 128), lambda i: (0, 0)),
                      pl.BlockSpec((128, 128), lambda i: (0, 0)),
                      pl.BlockSpec((1, 128), lambda i: (0, 0)),
                      pl.BlockSpec((128, 128), lambda i: (0, 0)),
                      pl.BlockSpec((1, 128), lambda i: (0, 0))],
            out_specs=pl.BlockSpec((TM, 128), lambda i: (i, 0))),
        compiler_params=pltpu.CompilerParams(dimension_semantics=("parallel",)),
    )(x, w1, b1, w2, b2, wh, bh)
    return out[:N]


def _loss_reduce_kernel(t_ref, o_ref, tt_ref, ot_ref, m_ref, out_ref, acc_ref):
    @pl.when(pl.program_id(0) == 0)
    def _():
        acc_ref[...] = jnp.zeros_like(acc_ref)

    x = o_ref[...]
    y = ot_ref[...]
    m = m_ref[...]
    # numerically-stable softplus pieces of BCE-with-logits
    sp = jnp.log1p(jnp.exp(-jnp.abs(x)))
    softplus_neg_x = sp + jnp.maximum(-x, 0.0)   # -log sigmoid(x)
    softplus_pos_x = sp + jnp.maximum(x, 0.0)    # -log(1 - sigmoid(x))
    t = t_ref[...]
    tt = tt_ref[...]
    lt = jnp.sign(t) * jnp.log1p(jnp.abs(t))     # apply_log_transform
    ltt = jnp.sign(tt) * jnp.log1p(jnp.abs(tt))

    # per-lane partial sums (reduce sublanes only), accumulate across grid steps
    acc_ref[0:1, :] += jnp.sum(m * y * softplus_neg_x, axis=0, keepdims=True)
    acc_ref[1:2, :] += jnp.sum(m * (1.0 - y) * softplus_pos_x, axis=0, keepdims=True)
    acc_ref[2:3, :] += jnp.sum(m, axis=0, keepdims=True)
    acc_ref[3:4, :] += jnp.sum(m * y, axis=0, keepdims=True)
    acc_ref[4:5, :] += jnp.sum(m * y * jnp.abs(lt - ltt), axis=0, keepdims=True)

    @pl.when(pl.program_id(0) == pl.num_programs(0) - 1)
    def _():
        # cross-lane reduce once at the end; broadcast so the store is lane-dense
        totals = jnp.sum(acc_ref[...], axis=1, keepdims=True)          # (8, 1)
        out_ref[...] = totals * jnp.ones((1, 128), jnp.float32)        # (8, 128)


def _loss_sums(t, o, tt, ot, m):
    n = int(t.shape[0])
    rows = pl.cdiv(n, 128)
    n_tiles = _next_pow2(pl.cdiv(rows, TR))       # bucket -> stable compiled shapes
    rows_pad = n_tiles * TR
    npad = rows_pad * 128

    def prep(a):
        a = jnp.asarray(a, jnp.float32).reshape(-1)
        return jnp.pad(a, (0, npad - n)).reshape(rows_pad, 128)

    out = pl.pallas_call(
        _loss_reduce_kernel,
        out_shape=jax.ShapeDtypeStruct((8, 128), jnp.float32),
        grid_spec=pltpu.PrefetchScalarGridSpec(
            num_scalar_prefetch=0, grid=(n_tiles,),
            in_specs=[pl.BlockSpec((TR, 128), lambda i: (i, 0))] * 5,
            out_specs=pl.BlockSpec((8, 128), lambda i: (0, 0)),
            scratch_shapes=[pltpu.VMEM((8, 128), jnp.float32)]),
        compiler_params=pltpu.CompilerParams(dimension_semantics=("arbitrary",)),
    )(prep(t), prep(o), prep(tt), prep(ot), prep(m))
    return out[0, 0], out[1, 0], out[2, 0], out[3, 0], out[4, 0]


def compute_loss(tsdf, occ, tsdf_target, occ_target, loss_weight=(1, 1),
                 mask=None, pos_weight=1.0):
    """All-device loss (returns a jax scalar, no host sync)."""
    t = jnp.asarray(tsdf, jnp.float32).reshape(-1)
    o = jnp.asarray(occ, jnp.float32).reshape(-1)
    tt = jnp.asarray(tsdf_target, jnp.float32).reshape(-1)
    ot = jnp.asarray(occ_target, jnp.float32).reshape(-1)
    m = (jnp.ones_like(ot) if mask is None
         else jnp.asarray(mask).reshape(-1).astype(jnp.float32))
    s1, s2, na, npos, sl1 = _loss_sums(t, o, tt, ot, m)
    npos_safe = jnp.maximum(npos, 1.0)
    na_safe = jnp.maximum(na, 1.0)
    w_for_1 = (na - npos) / npos_safe * pos_weight
    occ_loss = (w_for_1 * s1 + s2) / na_safe
    tsdf_loss = sl1 / npos_safe
    loss = loss_weight[0] * occ_loss + loss_weight[1] * tsdf_loss
    return jnp.where(npos > 0.0, loss, 0.0)


# ---------------------------------------------------------------------------
# JAX / numpy glue (no clean Pallas equivalent for the gathers)
# ---------------------------------------------------------------------------
def generate_grid(n_vox, interval):
    rng = [np.arange(0, n_vox[axis], interval, dtype=np.float32) for axis in range(3)]
    grid = np.stack(np.meshgrid(rng[0], rng[1], rng[2], indexing='ij'))
    return grid.reshape(1, 3, -1)


def _grid_sample_bilinear(feat, grid_xy):
    # feat: (C, H, W); grid_xy: (Npts, 2) normalized coords, align_corners=True
    C, H, W = feat.shape
    x = (grid_xy[:, 0] + 1.0) * (W - 1) / 2.0
    y = (grid_xy[:, 1] + 1.0) * (H - 1) / 2.0
    x0 = jnp.floor(x); x1 = x0 + 1.0
    y0 = jnp.floor(y); y1 = y0 + 1.0
    wx1 = x - x0; wx0 = 1.0 - wx1
    wy1 = y - y0; wy0 = 1.0 - wy1

    def gather(xi, yi):
        valid = ((xi >= 0) & (xi <= W - 1) & (yi >= 0) & (yi <= H - 1)).astype(feat.dtype)
        xc = jnp.clip(xi, 0, W - 1).astype(jnp.int32)
        yc = jnp.clip(yi, 0, H - 1).astype(jnp.int32)
        return feat[:, yc, xc] * valid[None, :]

    return (gather(x0, y0) * (wx0 * wy0)[None, :] + gather(x1, y0) * (wx1 * wy0)[None, :] +
            gather(x0, y1) * (wx0 * wy1)[None, :] + gather(x1, y1) * (wx1 * wy1)[None, :])


# TODO(synk): back_project's bilinear grid_sample is a data-dependent gather with
# no clean Pallas/TPU equivalent; kept in plain JAX glue.
def back_project(coords, origin, voxel_size, feats, KRcam):
    n_views, bs, c, h, w = feats.shape
    N = coords.shape[0]
    volume = np.zeros((N, c + 1), np.float32)
    count = np.zeros((N,), np.float32)
    for b in range(bs):
        batch_ind = np.nonzero(coords[:, 0] == b)[0]
        if batch_ind.size == 0:
            continue
        coords_b = jnp.asarray(coords[batch_ind][:, 1:], jnp.float32)
        grid_b = coords_b * voxel_size + jnp.asarray(origin[b], jnp.float32)[None, :]
        nV = grid_b.shape[0]
        rs = jnp.concatenate([grid_b.T, jnp.ones((1, nV), jnp.float32)], axis=0)  # (4, nV)
        proj = jnp.asarray(KRcam[:, b], jnp.float32)                              # (V, 4, 4)
        im_p = jnp.einsum('vij,jn->vin', proj, rs)
        im_x, im_y, im_z = im_p[:, 0], im_p[:, 1], im_p[:, 2]
        im_x = im_x / im_z
        im_y = im_y / im_z
        im_grid = jnp.stack([2 * im_x / (w - 1) - 1, 2 * im_y / (h - 1) - 1], axis=-1)
        mask = (jnp.abs(im_grid) <= 1).all(axis=-1) & (im_z > 0)                  # (V, nV)
        samp = jnp.stack([_grid_sample_bilinear(feats[v, b], im_grid[v])
                          for v in range(n_views)])                              # (V, c, nV)
        maskf = mask.astype(jnp.float32)
        samp = samp * maskf[:, None, :]
        im_zm = im_z * maskf
        cnt = maskf.sum(axis=0)
        denom = jnp.maximum(cnt, 1.0)
        fsum = samp.sum(axis=0) / denom[None, :]
        zsum = im_zm.sum(axis=0) / denom
        pos = (zsum > 0).astype(jnp.float32)
        npos = jnp.maximum(pos.sum(), 1.0)
        zmean = (zsum * pos).sum() / npos
        zstd = jnp.sqrt((((zsum - zmean) ** 2) * pos).sum()) + 1e-5
        znorm = jnp.where(zsum > 0, (zsum - zmean) / zstd, 0.0)
        feat_b = jnp.concatenate([fsum.T, znorm[:, None]], axis=1)  # (nV, c+1)
        volume[batch_ind] = np.asarray(feat_b)
        count[batch_ind] = np.asarray(cnt)
    return volume, count


# ---------------------------------------------------------------------------
# Config + network
# ---------------------------------------------------------------------------
class _NS:
    pass


def make_cfg():
    cfg = _NS()
    cfg.N_LAYER = 3
    cfg.THRESHOLDS = [0.0, 0.0, 0.0]
    cfg.N_VOX = [16, 16, 16]
    cfg.VOXEL_SIZE = 0.04
    cfg.POS_WEIGHT = 1.5
    cfg.TRAIN_NUM_SAMPLE = [4096, 16384, 65536]
    cfg.BACKBONE2D = _NS(); cfg.BACKBONE2D.ARC = 'fpn-mnas-1'
    cfg.FUSION = _NS(); cfg.FUSION.FUSION_ON = False; cfg.FUSION.FULL = False
    cfg.SPARSEREG = _NS(); cfg.SPARSEREG.DROPOUT = False
    return cfg


class NeuConNetPallas:
    """Coarse-to-fine network (inference forward pass)."""

    def __init__(self, cfg, key):
        self.cfg = cfg
        self.n_scales = len(cfg.THRESHOLDS) - 1
        alpha = int(cfg.BACKBONE2D.ARC.split('-')[-1])
        self.ch_in = [80 * alpha + 1, 96 + 40 * alpha + 2 + 1,
                      48 + 24 * alpha + 2 + 1, 24 + 24 + 2 + 1]
        self.channels = [96, 48, 24]
        # TODO(synk): SPVCNN's sparse 3D voxel convolutions (torchsparse) have no
        # clean Pallas equivalent; replaced with its per-point MLP path.
        # TODO(synk): GRUFusion skipped (FUSION_ON=False configuration).
        self.params = []
        for i in range(len(cfg.THRESHOLDS)):
            key, k1, k2, k3, k4 = jax.random.split(key, 5)
            cin, cout = self.ch_in[i], self.channels[i]
            cin_pad = ((cin + 127) // 128) * 128
            # bf16 weights (native MXU dtype); f32 biases added post-accumulation.
            w1 = jnp.zeros((cin_pad, 128), jnp.bfloat16).at[:cin, :].set(
                (0.05 * jax.random.normal(k1, (cin, 128), jnp.float32)).astype(jnp.bfloat16))
            b1 = jnp.zeros((1, 128), jnp.float32)
            w2 = jnp.zeros((128, 128), jnp.bfloat16).at[:, :cout].set(
                (0.05 * jax.random.normal(k2, (128, cout), jnp.float32)).astype(jnp.bfloat16))
            b2 = jnp.zeros((1, 128), jnp.float32)
            wh = jnp.zeros((128, 128), jnp.float32)
            wh = wh.at[:cout, TSDF_LANE].set(0.05 * jax.random.normal(k3, (cout,), jnp.float32))
            wh = wh.at[:cout, OCC_LANE].set(0.05 * jax.random.normal(k4, (cout,), jnp.float32))
            wh = wh.astype(jnp.bfloat16)
            bh = jnp.zeros((1, 128), jnp.float32).at[0, OCC_LANE].set(0.3)  # occ head bias
            self.params.append((w1, b1, w2, b2, wh, bh))

    def get_target(self, coords, inputs, scale):
        tsdf_t = np.asarray(inputs['tsdf_list'][scale])
        occ_t = np.asarray(inputs['occ_list'][scale])
        cxyz = coords[:, 1:].astype(np.int64) // (2 ** scale)
        b = coords[:, 0].astype(np.int64)
        return (tsdf_t[b, cxyz[:, 0], cxyz[:, 1], cxyz[:, 2]],
                occ_t[b, cxyz[:, 0], cxyz[:, 1], cxyz[:, 2]])

    @staticmethod
    def upsample(pre_feat, pre_coords, interval, num=8):
        pos_list = [1, 2, 3, [1, 2], [1, 3], [2, 3], [1, 2, 3]]
        n, c = pre_feat.shape
        up_feat = np.repeat(pre_feat[:, None, :], num, axis=1).reshape(-1, c)
        up_coords = np.repeat(pre_coords[:, None, :], num, axis=1).copy()
        for i in range(num - 1):
            up_coords[:, i + 1, pos_list[i]] += interval
        return up_feat, up_coords.reshape(-1, 4)

    def forward(self, features, inputs, outputs):
        bs = features[0][0].shape[0]
        pre_feat = None
        pre_coords = None
        up_feat = None
        loss_dict = {}
        origin = np.asarray(inputs['vol_origin_partial'], np.float32)
        w2ac = np.asarray(inputs['world_to_aligned_camera'], np.float32)
        for i in range(self.cfg.N_LAYER):
            interval = 2 ** (self.n_scales - i)
            scale = self.n_scales - i
            if i == 0:
                coords = generate_grid(self.cfg.N_VOX, interval)[0]
                ups = [np.concatenate(
                    [np.ones((1, coords.shape[-1]), np.float32) * b, coords], axis=0)
                    for b in range(bs)]
                up_coords = np.concatenate(ups, axis=1).T.copy()
            else:
                up_feat, up_coords = self.upsample(pre_feat, pre_coords, interval)

            feats = jnp.stack([feat[scale] for feat in features])  # (V, B, C, h, w)
            KRcam = np.transpose(np.asarray(inputs['proj_matrices'])[:, :, scale],
                                 (1, 0, 2, 3))
            volume, count = back_project(up_coords, origin, self.cfg.VOXEL_SIZE,
                                         feats, KRcam)
            grid_mask = count > 1
            feat = np.concatenate([volume, up_feat], axis=1) if i != 0 else volume

            tsdf_target, occ_target = self.get_target(up_coords, inputs, scale)

            # aligned-camera coordinates (would feed the sparse conv)
            r_coords = up_coords.astype(np.float32).copy()
            for b in range(bs):
                bi = np.nonzero(up_coords[:, 0] == b)[0]
                cb = up_coords[bi][:, 1:].astype(np.float32) * self.cfg.VOXEL_SIZE + origin[b]
                cb = np.concatenate([cb, np.ones_like(cb[:, :1])], axis=1)
                cb = cb @ w2ac[b, :3, :].T
                r_coords[bi, 1:] = cb
            r_coords = r_coords[:, [1, 2, 3, 0]]

            # SPVCNN stand-in + tsdf/occ Linear heads (fused Pallas kernel).
            # Single (N,128) output slab: [:cout]=feat, lane 126=tsdf, lane 127=occ.
            out_dev = voxel_head(jnp.asarray(feat, jnp.float32), self.params[i])

            # Loss entirely on device (jax scalar, no per-layer float() sync).
            loss = compute_loss(out_dev[:, TSDF_LANE:TSDF_LANE + 1],
                                out_dev[:, OCC_LANE:OCC_LANE + 1],
                                tsdf_target, occ_target,
                                mask=grid_mask, pos_weight=self.cfg.POS_WEIGHT)
            loss_dict[f'tsdf_occ_loss_{i}'] = loss

            # Single device->host transfer per layer for data-dependent selection.
            out_np = np.asarray(out_dev)
            feat_out = out_np[:, :self.channels[i]]
            tsdf = out_np[:, TSDF_LANE:TSDF_LANE + 1]
            occ = out_np[:, OCC_LANE:OCC_LANE + 1]

            occupancy = (occ[:, 0] > self.cfg.THRESHOLDS[i]) & grid_mask
            num = int(occupancy.sum())
            if num == 0:
                print('no valid points: scale {}'.format(i))
                return outputs, loss_dict
            pre_coords = up_coords[occupancy]
            for b in range(bs):
                if int((pre_coords[:, 0] == b).sum()) == 0:
                    print('no valid points: scale {}, batch {}'.format(i, b))
                    return outputs, loss_dict
            pre_feat = feat_out[occupancy]
            pre_tsdf = tsdf[occupancy]
            pre_occ = occ[occupancy]
            pre_feat = np.concatenate([pre_feat, pre_tsdf, pre_occ], axis=1)
            if i == self.cfg.N_LAYER - 1:
                outputs['coords'] = jnp.asarray(pre_coords)
                outputs['tsdf'] = jnp.asarray(pre_tsdf)
        return outputs, loss_dict


# ---------------------------------------------------------------------------
# Main
# ---------------------------------------------------------------------------
if __name__ == "__main__":
    cfg = make_cfg()
    key = jax.random.PRNGKey(0)
    key, kmodel = jax.random.split(key)
    net = NeuConNetPallas(cfg, kmodel)

    bs, n_views, H, W = 2, 2, 16, 16
    feat_chans = [24, 40, 80]  # pyramid channels per scale (alpha = 1)
    features = []
    for v in range(n_views):
        pyr = []
        for s in range(3):
            key, kk = jax.random.split(key)
            hs, ws = H // (2 ** s), W // (2 ** s)
            pyr.append(jax.random.normal(kk, (bs, feat_chans[s], hs, ws), jnp.float32))
        features.append(pyr)

    # camera / projection setup so voxels project inside every view
    origin = np.tile(np.array([-0.32, -0.32, 0.8], np.float32), (bs, 1))
    proj = np.zeros((bs, n_views, 3, 4, 4), np.float32)
    for b in range(bs):
        for v in range(n_views):
            E = np.eye(4, dtype=np.float32)
            E[0, 3] = -0.03 * v
            for s in range(3):
                hs, ws = H // (2 ** s), W // (2 ** s)
                K = np.eye(4, dtype=np.float32)
                K[0, 0] = (ws - 1) / 0.9
                K[1, 1] = (hs - 1) / 0.9
                K[0, 2] = (ws - 1) / 2.0
                K[1, 2] = (hs - 1) / 2.0
                proj[b, v, s] = K @ E
    w2ac = np.tile(np.eye(4, dtype=np.float32), (bs, 1, 1))

    tsdf_list, occ_list = [], []
    for s in range(3):
        d = cfg.N_VOX[0] // (2 ** s)
        key, kk = jax.random.split(key)
        t = np.asarray(jax.random.uniform(kk, (bs, d, d, d), jnp.float32, -1.0, 1.0))
        tsdf_list.append(t)
        occ_list.append((np.abs(t) < 0.7).astype(np.float32))

    inputs = {
        'vol_origin_partial': origin,
        'proj_matrices': proj,
        'world_to_aligned_camera': w2ac,
        'tsdf_list': tsdf_list,
        'occ_list': occ_list,
    }

    outputs = {}
    outputs, loss_dict = net.forward(features, inputs, outputs)
    if 'tsdf' in outputs:
        jax.block_until_ready(outputs['tsdf'])
    for v in loss_dict.values():
        jax.block_until_ready(v)
    print("KERNEL_OK")
</pallas_src>

<mosaic_0001>
module attributes {stable_mosaic.version = 11 : i64} {
  func.func @_voxel_head_kernel(%arg0: i32, %arg1: memref<512x128xbf16, #tpu.memory_space<vmem>>, %arg2: memref<128x128xbf16, #tpu.memory_space<vmem>>, %arg3: memref<1x128xf32, #tpu.memory_space<vmem>>, %arg4: memref<128x128xbf16, #tpu.memory_space<vmem>>, %arg5: memref<1x128xf32, #tpu.memory_space<vmem>>, %arg6: memref<128x128xbf16, #tpu.memory_space<vmem>>, %arg7: memref<1x128xf32, #tpu.memory_space<vmem>>, %arg8: memref<512x128xf32, #tpu.memory_space<vmem>>) attributes {dimension_semantics = [#tpu.dimension_semantics<parallel>], iteration_bounds = array<i64: 1>, scalar_prefetch = 0 : i64, scratch_operands = 0 : i64, tpu.core_type = #tpu.core_type<tc>, window_params = [{transform_indices = @transform_0, window_bounds = array<i64: 512, 128>}, {pipeline_mode = #tpu.pipeline_mode<synchronous>, transform_indices = @transform_1, window_bounds = array<i64: 128, 128>}, {pipeline_mode = #tpu.pipeline_mode<synchronous>, transform_indices = @transform_2, window_bounds = array<i64: 1, 128>}, {pipeline_mode = #tpu.pipeline_mode<synchronous>, transform_indices = @transform_3, window_bounds = array<i64: 128, 128>}, {pipeline_mode = #tpu.pipeline_mode<synchronous>, transform_indices = @transform_4, window_bounds = array<i64: 1, 128>}, {pipeline_mode = #tpu.pipeline_mode<synchronous>, transform_indices = @transform_5, window_bounds = array<i64: 128, 128>}, {pipeline_mode = #tpu.pipeline_mode<synchronous>, transform_indices = @transform_6, window_bounds = array<i64: 1, 128>}, {transform_indices = @transform_7, window_bounds = array<i64: 512, 128>}]} {
    %c0 = arith.constant 0 : index
    %c0_0 = arith.constant 0 : index
    %0 = vector.load %arg1[%c0, %c0_0] : memref<512x128xbf16, #tpu.memory_space<vmem>>, vector<512x128xbf16>
    %c0_1 = arith.constant 0 : index
    %c0_2 = arith.constant 0 : index
    %1 = vector.load %arg2[%c0_1, %c0_2] : memref<128x128xbf16, #tpu.memory_space<vmem>>, vector<128x128xbf16>
    %cst = arith.constant dense<0.000000e+00> : vector<512x128xf32>
    %2 = tpu.matmul %0, %1, %cst {dimension_numbers = #tpu.dot_dimension_numbers<[1], [0], [0], [1], [0, 0, 1, 1], [], []>} : vector<512x128xbf16>, vector<128x128xbf16>, vector<512x128xf32> -> vector<512x128xf32>
    %c0_3 = arith.constant 0 : index
    %c0_4 = arith.constant 0 : index
    %3 = vector.load %arg3[%c0_3, %c0_4] : memref<1x128xf32, #tpu.memory_space<vmem>>, vector<1x128xf32>
    %4 = vector.broadcast %3 : vector<1x128xf32> to vector<512x128xf32>
    %5 = arith.addf %2, %4 : vector<512x128xf32>
    %cst_5 = arith.constant 0.000000e+00 : f32
    %6 = vector.broadcast %cst_5 : f32 to vector<512x128xf32>
    %7 = arith.maximumf %5, %6 : vector<512x128xf32>
    %8 = arith.truncf %7 : vector<512x128xf32> to vector<512x128xbf16>
    %c0_6 = arith.constant 0 : index
    %c0_7 = arith.constant 0 : index
    %9 = vector.load %arg4[%c0_6, %c0_7] : memref<128x128xbf16, #tpu.memory_space<vmem>>, vector<128x128xbf16>
    %cst_8 = arith.constant dense<0.000000e+00> : vector<512x128xf32>
    %10 = tpu.matmul %8, %9, %cst_8 {dimension_numbers = #tpu.dot_dimension_numbers<[1], [0], [0], [1], [0, 0, 1, 1], [], []>} : vector<512x128xbf16>, vector<128x128xbf16>, vector<512x128xf32> -> vector<512x128xf32>
    %c0_9 = arith.constant 0 : index
    %c0_10 = arith.constant 0 : index
    %11 = vector.load %arg5[%c0_9, %c0_10] : memref<1x128xf32, #tpu.memory_space<vmem>>, vector<1x128xf32>
    %12 = vector.broadcast %11 : vector<1x128xf32> to vector<512x128xf32>
    %13 = arith.addf %10, %12 : vector<512x128xf32>
    %cst_11 = arith.constant 0.000000e+00 : f32
    %14 = vector.broadcast %cst_11 : f32 to vector<512x128xf32>
    %15 = arith.maximumf %13, %14 : vector<512x128xf32>
    %16 = arith.truncf %15 : vector<512x128xf32> to vector<512x128xbf16>
    %c0_12 = arith.constant 0 : index
    %c0_13 = arith.constant 0 : index
    %17 = vector.load %arg6[%c0_12, %c0_13] : memref<128x128xbf16, #tpu.memory_space<vmem>>, vector<128x128xbf16>
    %cst_14 = arith.constant dense<0.000000e+00> : vector<512x128xf32>
    %18 = tpu.matmul %16, %17, %cst_14 {dimension_numbers = #tpu.dot_dimension_numbers<[1], [0], [0], [1], [0, 0, 1, 1], [], []>} : vector<512x128xbf16>, vector<128x128xbf16>, vector<512x128xf32> -> vector<512x128xf32>
    %c0_15 = arith.constant 0 : index
    %c0_16 = arith.constant 0 : index
    %19 = vector.load %arg7[%c0_15, %c0_16] : memref<1x128xf32, #tpu.memory_space<vmem>>, vector<1x128xf32>
    %20 = vector.broadcast %19 : vector<1x128xf32> to vector<512x128xf32>
    %21 = arith.addf %18, %20 : vector<512x128xf32>
    %22 = arith.addf %15, %21 : vector<512x128xf32>
    %c0_17 = arith.constant 0 : index
    %c0_18 = arith.constant 0 : index
    %23 = vector.load %arg8[%c0_17, %c0_18] : memref<512x128xf32, #tpu.memory_space<vmem>>, vector<512x128xf32>
    tpu.vector_store %arg8[%c0_17, %c0_18], %22 {strides = array<i32>} : memref<512x128xf32, #tpu.memory_space<vmem>>, vector<512x128xf32>,
    return
  }
  func.func @transform_0(%arg0: i32) -> (i32, i32) {
    %c0_i32 = arith.constant 0 : i32
    %c0_i32_0 = arith.constant 0 : i32
    return %arg0, %c0_i32 : i32, i32
  }
  func.func @transform_1(%arg0: i32) -> (i32, i32) {
    %c0_i32 = arith.constant 0 : i32
    %c0_i32_0 = arith.constant 0 : i32
    %c0_i32_1 = arith.constant 0 : i32
    return %c0_i32, %c0_i32_0 : i32, i32
  }
  func.func @transform_2(%arg0: i32) -> (i32, i32) {
    %c0_i32 = arith.constant 0 : i32
    %c0_i32_0 = arith.constant 0 : i32
    %c0_i32_1 = arith.constant 0 : i32
    return %c0_i32, %c0_i32_0 : i32, i32
  }
  func.func @transform_3(%arg0: i32) -> (i32, i32) {
    %c0_i32 = arith.constant 0 : i32
    %c0_i32_0 = arith.constant 0 : i32
    %c0_i32_1 = arith.constant 0 : i32
    return %c0_i32, %c0_i32_0 : i32, i32
  }
  func.func @transform_4(%arg0: i32) -> (i32, i32) {
    %c0_i32 = arith.constant 0 : i32
    %c0_i32_0 = arith.constant 0 : i32
    %c0_i32_1 = arith.constant 0 : i32
    return %c0_i32, %c0_i32_0 : i32, i32
  }
  func.func @transform_5(%arg0: i32) -> (i32, i32) {
    %c0_i32 = arith.constant 0 : i32
    %c0_i32_0 = arith.constant 0 : i32
    %c0_i32_1 = arith.constant 0 : i32
    return %c0_i32, %c0_i32_0 : i32, i32
  }
  func.func @transform_6(%arg0: i32) -> (i32, i32) {
    %c0_i32 = arith.constant 0 : i32
    %c0_i32_0 = arith.constant 0 : i32
    %c0_i32_1 = arith.constant 0 : i32
    return %c0_i32, %c0_i32_0 : i32, i32
  }
  func.func @transform_7(%arg0: i32) -> (i32, i32) {
    %c0_i32 = arith.constant 0 : i32
    %c0_i32_0 = arith.constant 0 : i32
    return %arg0, %c0_i32 : i32, i32
  }
}

</mosaic_0001>

<bundles_post_ra>
// kernel: tpu_custom_call.1
= control target key start
LH: loop header
LB: loop body
LE: loop exit
PB: predicated region body
PF: predicated region fallthrough
CT: control target
= control target key end

     0   :  { %12 = vsyncpa [#allocation3], 0  ;;  %s3157_s0 = inlined_call_operand.hbm [shape: bf16[512,128], index: 0, kind: input, shape index: {}]   ;;  %s3158_s1 = inlined_call_operand.hbm [shape: bf16[128,128], index: 1, kind: input, shape index: {}]   ;;  %s3159_s2 = inlined_call_operand.vmem [shape: f32[1,128], index: 2, kind: input, shape index: {}]   ;;  %s3160_s3 = inlined_call_operand.hbm [shape: bf16[128,128], index: 3, kind: input, shape index: {}]   ;;  %s3161_s4 = inlined_call_operand.vmem [shape: f32[1,128], index: 4, kind: input, shape index: {}]   ;;  %s3162_s5 = inlined_call_operand.hbm [shape: bf16[128,128], index: 5, kind: input, shape index: {}]   ;;  %s3163_s6 = inlined_call_operand.vmem [shape: f32[1,128], index: 6, kind: input, shape index: {}]   ;;  %s3164_s7 = inlined_call_operand.hbm [shape: f32[512,128], index: 7, kind: output, shape index: {}]  }
   0x1   :  { %13 = vsyncpa [#allocation6], 0 }
   0x2   :  { %14 = vsyncpa [#allocation9], 0 }
   0x3   :  { %15 = vsyncpa [#allocation4], 0  ;;  %s2366_s24 = smov [#allocation5]   ;;  %s2367_s26 = smov [#allocation2]  }
   0x4   :  { %s33_s25 = sshll.u32 %s2366_s24, 4  ;;  %s21_s27 = sshll.u32 %s2367_s26, 4  ;;  %s34_s25 = int_to_ptr.vmem [resolvable:$true] %s33_s25  ;;  %s22_s27 = int_to_ptr.vmem [resolvable:$true] %s21_s27 }
   0x5   :  { %s2266_s28 = scalar_lea.vmem %s34_s25, 1024  ;;  %p2271_p1 = scmp.lt.s32.totalorder %s34_s25, %s34_s25 }
   0x6   :  { %p2267_p0 = scmp.ne.s32.totalorder %s34_s25, %s2266_s28  ;;  %p2272_p2 = scmp.lt.s32.totalorder %s2266_s28, %s2266_s28 }
   0x8   :  { %p2273_p3 = por %p2272_p2, %p2271_p1 }
   0xa   :  { %p2274_p4 = pnand %p2273_p3, %p2267_p0 }
   0xc   :  { %2277 = shalt.err (!%p2274_p4)
}
   0xd   :  { %s2368_s29 = smov 64   ;;  %s2369_s30 = smov 4  }
   0xe   :  { %39 = dma.hbm_to_vmem [thread:$0]  %s3158_s1, 1024, %s34_s25, [#allocation6], %s2368_s29, %s2368_s29, %s2369_s30  }
   0xf   :  { %s2286_s10 = scalar_lea.vmem %s22_s27, 4096  ;;  %p2291_p6 = scmp.lt.s32.totalorder %s22_s27, %s22_s27 }
  0x10   :  { %p2287_p5 = scmp.ne.s32.totalorder %s22_s27, %s2286_s10  ;;  %p2292_p7 = scmp.lt.s32.totalorder %s2286_s10, %s2286_s10 }
  0x12   :  { %p2293_p8 = por %p2292_p7, %p2291_p6 }
  0x14   :  { %p2294_p9 = pnand %p2293_p8, %p2287_p5 }
  0x16   :  { %2297 = shalt.err (!%p2294_p9)
}
  0x17   :  { %27 = dma.hbm_to_vmem [thread:$0]  %s3157_s0, 4096, %s22_s27, [#allocation3], %s2368_s29, %s2368_s29, %s2369_s30  }
  0x18   :  { %s2370_s13 = smov [#allocation7]   ;;  %s2371_s15 = smov [#allocation8]  }
  0x19   :  { %s47_s14 = sshll.u32 %s2370_s13, 4  ;;  %s61_s16 = sshll.u32 %s2371_s15, 4  ;;  %s48_s14 = int_to_ptr.vmem [resolvable:$true] %s47_s14  ;;  %s62_s16 = int_to_ptr.vmem [resolvable:$true] %s61_s16 }
  0x1a   :  { %s2306_s1 = scalar_lea.vmem %s48_s14, 1024  ;;  %p2311_p11 = scmp.lt.s32.totalorder %s48_s14, %s48_s14 }
  0x1b   :  { %p2307_p10 = scmp.ne.s32.totalorder %s48_s14, %s2306_s1  ;;  %p2312_p12 = scmp.lt.s32.totalorder %s2306_s1, %s2306_s1 }
  0x1d   :  { %p2313_p13 = por %p2312_p12, %p2311_p11 }
  0x1f   :  { %p2314_p0 = pnand %p2313_p13, %p2307_p10 }
  0x21   :  { %2317 = shalt.err (!%p2314_p0)
}
  0x22   :  { %53 = dma.hbm_to_vmem [thread:$0]  %s3160_s3, 1024, %s48_s14, [#allocation6], %s2368_s29, %s2368_s29, %s2369_s30  }
  0x23   :  { %s2326_s0 = scalar_lea.vmem %s62_s16, 1024  ;;  %p2331_p2 = scmp.lt.s32.totalorder %s62_s16, %s62_s16 }
  0x24   :  { %p2327_p1 = scmp.ne.s32.totalorder %s62_s16, %s2326_s0  ;;  %p2332_p3 = scmp.lt.s32.totalorder %s2326_s0, %s2326_s0 }
  0x26   :  { %p2333_p4 = por %p2332_p3, %p2331_p2 }
  0x28   :  { %p2334_p5 = pnand %p2333_p4, %p2327_p1 }
  0x2a   :  { %2337 = shalt.err (!%p2334_p5)
}
  0x2b   :  { %67 = dma.hbm_to_vmem [thread:$0]  %s3162_s5, 1024, %s62_s16, [#allocation9], %s2368_s29, %s2368_s29, %s2369_s30  }
  0x2c   :  { %2358 = dma.done.wait [#allocation3], 4096  }
  0x2d   :  { %2359 = vsyncadd [#allocation3], 4294963200 }
  0x2e   :  { %2360 = dma.done.wait [#allocation6], 2048  }
  0x2f   :  { %2361 = vsyncadd [#allocation6], 4294965248 }
  0x30   :  { %2362 = dma.done.wait [#allocation9], 1024  }
  0x31   :  { %2363 = vsyncadd [#allocation9], 4294966272  ;;  %v2202_v0 = vld [vmem:[#allocation5 + $0x38] sm:$0xff]   ;;  %v2203_v1 = vld [vmem:[#allocation5 + $0x30] sm:$0xff]  }
  0x32   :  { %1937 = vmatprep.subr.bf16.mxu0 %v2202_v0  ;;  %2177 = vmatprep.subr.bf16.mxu1 %v2202_v0  ;;  %v2204_v2 = vld [vmem:[#allocation5 + $0x28] sm:$0xff]   ;;  %v2205_v3 = vld [vmem:[#allocation5 + $0x20] sm:$0xff]   ;;  %v2206_v5 = vld [vmem:[#allocation5 + $0x18] sm:$0xff]  }
  0x33   :  { %1938 = vmatpush3.bf16.msra.mxu0 %v2202_v0  ;;  %2185 = vmatpush3.bf16.msra.mxu1 %v2202_v0  ;;  %v2210_v4 = vld [vmem:[#allocation2] sm:$0xff]   ;;  %v2207_v6 = vld [vmem:[#allocation5 + $0x10] sm:$0xff]   ;;  %v2208_v7 = vld [vmem:[#allocation5 + $0x8] sm:$0xff]  }
  0x34   :  { %1939 = vmatprep.subr.bf16.mxu0 %v2203_v1  ;;  %2178 = vmatprep.subr.bf16.mxu1 %v2203_v1  ;;  %v2209_v8 = vld [vmem:[#allocation5] sm:$0xff]   ;;  %v2211_v10 = vld [vmem:[#allocation2 + $0x8] sm:$0xff]   ;;  %v2212_v11 = vld [vmem:[#allocation2 + $0x10] sm:$0xff]  }
  0x35   :  { %1953 = vmatprep.mubr.bf16.mxu0 %v2210_v4  ;;  %v2226_v9 = vld [vmem:[#allocation2 + $0x80] sm:$0xff]   ;;  %v2227_v12 = vld [vmem:[#allocation2 + $0x88] sm:$0xff]   ;;  %v2228_v13 = vld [vmem:[#allocation2 + $0x90] sm:$0xff]  }
  0x36   :  { %1985 = vmatprep.mubr.bf16.mxu1 %v2226_v9  ;;  %v2213_v14 = vld [vmem:[#allocation2 + $0x18] sm:$0xff]   ;;  %v2214_v15 = vld [vmem:[#allocation2 + $0x20] sm:$0xff]   ;;  %v2243_v19 = vld [vmem:[#allocation7 + $0x30] sm:$0xff]  }
  0x37   :  { %1940 = vmatpush3.bf16.msra.mxu0 %v2203_v1  ;;  %2186 = vmatpush3.bf16.msra.mxu1 %v2203_v1  ;;  %v2229_v16 = vld [vmem:[#allocation2 + $0x98] sm:$0xff]   ;;  %v2230_v17 = vld [vmem:[#allocation2 + $0xa0] sm:$0xff]   ;;  %v2215_v20 = vld [vmem:[#allocation2 + $0x28] sm:$0xff]  }
  0x38   :  { %1941 = vmatprep.subr.bf16.mxu0 %v2204_v2  ;;  %2179 = vmatprep.subr.bf16.mxu1 %v2204_v2  ;;  %v2242_v18 = vld [vmem:[#allocation7 + $0x38] sm:$0xff]   ;;  %v2231_v21 = vld [vmem:[#allocation2 + $0xa8] sm:$0xff]   ;;  %v2216_v22 = vld [vmem:[#allocation2 + $0x30] sm:$0xff]  }
  0x39   :  { %v2232_v23 = vld [vmem:[#allocation2 + $0xb0] sm:$0xff]   ;;  %v2244_v24 = vld [vmem:[#allocation7 + $0x28] sm:$0xff]   ;;  %v2245_v25 = vld [vmem:[#allocation7 + $0x20] sm:$0xff]  }
  0x3a   :  { %v2217_v26 = vld [vmem:[#allocation2 + $0x38] sm:$0xff]   ;;  %v2218_v28 = vld [vmem:[#allocation2 + $0x40] sm:$0xff]   ;;  %v2247_v31 = vld [vmem:[#allocation7 + $0x10] sm:$0xff]  }
  0x3b   :  { %1942 = vmatpush3.bf16.msra.mxu0 %v2204_v2  ;;  %2187 = vmatpush3.bf16.msra.mxu1 %v2204_v2  ;;  %v2233_v27 = vld [vmem:[#allocation2 + $0xb8] sm:$0xff]   ;;  %v2234_v29 = vld [vmem:[#allocation2 + $0xc0] sm:$0xff]   ;;  %v2219_v32 = vld [vmem:[#allocation2 + $0x48] sm:$0xff]  }
  0x3c   :  { %1943 = vmatprep.subr.bf16.mxu0 %v2205_v3  ;;  %2180 = vmatprep.subr.bf16.mxu1 %v2205_v3  ;;  %v2246_v30 = vld [vmem:[#allocation7 + $0x18] sm:$0xff]   ;;  %v2235_v33 = vld [vmem:[#allocation2 + $0xc8] sm:$0xff]   ;;  %v2220_v34 = vld [vmem:[#allocation2 + $0x50] sm:$0xff]  }
  0x3d   :  { %v2236_v35 = vld [vmem:[#allocation2 + $0xd0] sm:$0xff]   ;;  %v2248_v36 = vld [vmem:[#allocation7 + $0x8] sm:$0xff]   ;;  %v2221_v37 = vld [vmem:[#allocation2 + $0x58] sm:$0xff]  }
  0x3e   :  { %v2237_v38 = vld [vmem:[#allocation2 + $0xd8] sm:$0xff]   ;;  %v2222_v39 = vld [vmem:[#allocation2 + $0x60] sm:$0xff]   ;;  %v2223_v41 = vld [vmem:[#allocation2 + $0x68] sm:$0xff]  }
  0x3f   :  { %1944 = vmatpush3.bf16.msra.mxu0 %v2205_v3  ;;  %2188 = vmatpush3.bf16.msra.mxu1 %v2205_v3  ;;  %v2238_v40 = vld [vmem:[#allocation2 + $0xe0] sm:$0xff]   ;;  %v2239_v42 = vld [vmem:[#allocation2 + $0xe8] sm:$0xff]   ;;  %v2224_v43 = vld [vmem:[#allocation2 + $0x70] sm:$0xff]  }
  0x40   :  { %1945 = vmatprep.subr.bf16.mxu0 %v2206_v5  ;;  %2181 = vmatprep.subr.bf16.mxu1 %v2206_v5  ;;  %v2240_v44 = vld [vmem:[#allocation2 + $0xf0] sm:$0xff]   ;;  %v2225_v45 = vld [vmem:[#allocation2 + $0x78] sm:$0xff]   ;;  %v2249_v47 = vld [vmem:[#allocation7] sm:$0xff]  }
  0x41   :  { %v2241_v46 = vld [vmem:[#allocation2 + $0xf8] sm:$0xff]   ;;  %v2446_v52 = vld [vmem:[%s3159_s2] ss:$0 sm:$0xff]  ;;  %v2251_v61 = vld [vmem:[#allocation8 + $0x30] sm:$0xff]  }
  0x42   :  { %v2250_v60 = vld [vmem:[#allocation8 + $0x38] sm:$0xff]  }
  0x43   :  { %1946 = vmatpush3.bf16.msra.mxu0 %v2206_v5  ;;  %2189 = vmatpush3.bf16.msra.mxu1 %v2206_v5 }
  0x44   :  { %1947 = vmatprep.subr.bf16.mxu0 %v2207_v6  ;;  %2182 = vmatprep.subr.bf16.mxu1 %v2207_v6 }
  0x47   :  { %1948 = vmatpush3.bf16.msra.mxu0 %v2207_v6  ;;  %2190 = vmatpush3.bf16.msra.mxu1 %v2207_v6 }
  0x48   :  { %1949 = vmatprep.subr.bf16.mxu0 %v2208_v7  ;;  %2183 = vmatprep.subr.bf16.mxu1 %v2208_v7 }
  0x4b   :  { %1950 = vmatpush3.bf16.msra.mxu0 %v2208_v7  ;;  %2191 = vmatpush3.bf16.msra.mxu1 %v2208_v7  ;;  %v2252_v7 = vld [vmem:[#allocation8 + $0x28] sm:$0xff]  }
  0x4c   :  { %1951 = vmatprep.subr.bf16.mxu0 %v2209_v8  ;;  %2184 = vmatprep.subr.bf16.mxu1 %v2209_v8 }
  0x4f   :  { %1952 = vmatpush3.bf16.msra.mxu0 %v2209_v8  ;;  %2192 = vmatpush3.bf16.msra.mxu1 %v2209_v8 }
  0x50   :  { %2017 = vmatprep.subr.bf16.mxu1 %v2242_v18  ;;  %2097 = vmatprep.subr.bf16.mxu0 %v2250_v60 }
  0x52   :  { %1954 = vmatmul.mubr.bf16.vlgmr.msra.gmra.mxu0 %v2211_v10  ;;  %1986 = vmatmul.mubr.bf16.vlgmr.msra.gmra.mxu1 %v2227_v12 }
  0x53   :  { %1957 = vmatprep.mubr.bf16.mxu0 %v2212_v11  ;;  %1989 = vmatprep.mubr.bf16.mxu1 %v2228_v13 }
  0x54   :  { %2018 = vmatpush3.bf16.msra.mxu1 %v2242_v18  ;;  %2098 = vmatpush3.bf16.msra.mxu0 %v2250_v60 }
  0x55   :  { %2019 = vmatprep.subr.bf16.mxu1 %v2243_v19  ;;  %2099 = vmatprep.subr.bf16.mxu0 %v2251_v61 }
  0x58   :  { %2020 = vmatpush3.bf16.msra.mxu1 %v2243_v19  ;;  %2100 = vmatpush3.bf16.msra.mxu0 %v2251_v61 }
  0x59   :  { %2021 = vmatprep.subr.bf16.mxu1 %v2244_v24  ;;  %2101 = vmatprep.subr.bf16.mxu0 %v2252_v7 }
  0x5a   :  { %1958 = vmatmul.mubr.bf16.gmra.mxu0 %v2213_v14  ;;  %1990 = vmatmul.mubr.bf16.gmra.mxu1 %v2229_v16  ;;  %v2253_v16 = vld [vmem:[#allocation8 + $0x20] sm:$0xff]  }
  0x5b   :  { %1961 = vmatprep.mubr.bf16.mxu0 %v2214_v15  ;;  %1993 = vmatprep.mubr.bf16.mxu1 %v2230_v17 }
  0x5c   :  { %2022 = vmatpush3.bf16.msra.mxu1 %v2244_v24  ;;  %2102 = vmatpush3.bf16.msra.mxu0 %v2252_v7 }
  0x5d   :  { %2023 = vmatprep.subr.bf16.mxu1 %v2245_v25  ;;  %2103 = vmatprep.subr.bf16.mxu0 %v2253_v16 }
  0x60   :  { %2024 = vmatpush3.bf16.msra.mxu1 %v2245_v25  ;;  %v2254_v25 = vld [vmem:[#allocation8 + $0x18] sm:$0xff]   ;;  %2104 = vmatpush3.bf16.msra.mxu0 %v2253_v16 }
  0x61   :  { %2025 = vmatprep.subr.bf16.mxu1 %v2246_v30  ;;  %2105 = vmatprep.subr.bf16.mxu0 %v2254_v25 }
  0x62   :  { %1962 = vmatmul.mubr.bf16.gmra.mxu0 %v2215_v20  ;;  %1994 = vmatmul.mubr.bf16.gmra.mxu1 %v2231_v21 }
  0x63   :  { %1965 = vmatprep.mubr.bf16.mxu0 %v2216_v22  ;;  %1997 = vmatprep.mubr.bf16.mxu1 %v2232_v23 }
  0x64   :  { %2026 = vmatpush3.bf16.msra.mxu1 %v2246_v30  ;;  %2106 = vmatpush3.bf16.msra.mxu0 %v2254_v25 }
  0x65   :  { %2027 = vmatprep.subr.bf16.mxu1 %v2247_v31 }
  0x68   :  { %2028 = vmatpush3.bf16.msra.mxu1 %v2247_v31 }
  0x69   :  { %2029 = vmatprep.subr.bf16.mxu1 %v2248_v36 }
  0x6a   :  { %1966 = vmatmul.mubr.bf16.gmra.mxu0 %v2217_v26  ;;  %1998 = vmatmul.mubr.bf16.gmra.mxu1 %v2233_v27 }
  0x6b   :  { %1969 = vmatprep.mubr.bf16.mxu0 %v2218_v28  ;;  %2001 = vmatprep.mubr.bf16.mxu1 %v2234_v29 }
  0x6c   :  { %2030 = vmatpush3.bf16.msra.mxu1 %v2248_v36 }
  0x6d   :  { %2031 = vmatprep.subr.bf16.mxu1 %v2249_v47 }
  0x70   :  { %2032 = vmatpush3.bf16.msra.mxu1 %v2249_v47 }
  0x72   :  { %1970 = vmatmul.mubr.bf16.gmra.mxu0 %v2219_v32  ;;  %2002 = vmatmul.mubr.bf16.gmra.mxu1 %v2235_v33 }
  0x73   :  { %1973 = vmatprep.mubr.bf16.mxu0 %v2220_v34  ;;  %2005 = vmatprep.mubr.bf16.mxu1 %v2236_v35  ;;  %v2255_v34 = vld [vmem:[#allocation8 + $0x10] sm:$0xff]  }
  0x74   :  { %2107 = vmatprep.subr.bf16.mxu0 %v2255_v34 }
  0x75   :  { %2108 = vmatpush3.bf16.msra.mxu0 %v2255_v34 }
  0x7a   :  { %1974 = vmatmul.mubr.bf16.gmra.mxu0 %v2221_v37  ;;  %2006 = vmatmul.mubr.bf16.gmra.mxu1 %v2237_v38 }
  0x7b   :  { %1977 = vmatprep.mubr.bf16.mxu0 %v2222_v39  ;;  %2009 = vmatprep.mubr.bf16.mxu1 %v2238_v40 }
  0x82   :  { %1978 = vmatmul.mubr.bf16.gmra.mxu0 %v2223_v41  ;;  %2010 = vmatmul.mubr.bf16.gmra.mxu1 %v2239_v42 }
  0x83   :  { %1981 = vmatprep.mubr.bf16.mxu0 %v2224_v43  ;;  %2013 = vmatprep.mubr.bf16.mxu1 %v2240_v44  ;;  %v2256_v43 = vld [vmem:[#allocation8 + $0x8] sm:$0xff]  }
  0x84   :  { %2109 = vmatprep.subr.bf16.mxu0 %v2256_v43 }
  0x85   :  { %2110 = vmatpush3.bf16.msra.mxu0 %v2256_v43 }
  0x8a   :  { %1982 = vmatmul.mubr.bf16.gmra.mxu0 %v2225_v45  ;;  %2014 = vmatmul.mubr.bf16.gmra.mxu1 %v2241_v46 }
 0x112   :  { %v1955_v48 = vpop.f32.mrf.mxu0  ;;  %v2439_v49 = vpop.f32.mrf.mxu1 }
 0x113   :  { %v453_v57 = vadd.f32 %v1955_v48, %v2446_v52 }
 0x114   :  { %v444_v50 = vpop.f32.mrf.mxu0  ;;  %v2441_v51 = vpop.f32.mrf.mxu1 }
 0x115   :  { %v445_v55 = vadd.f32 %v2446_v52, %v444_v50  ;;  %v701_v4 = vmax.f32 %v453_v57, 0.0 }
 0x116   :  { %v1956_v53 = vpop.f32.mrf.mxu0  ;;  %v2448_v54 = vpop.f32.mrf.mxu1 }
 0x117   :  { %v456_v56 = vadd.f32 %v1956_v53, %v2446_v52  ;;  %v699_v2 = vmax.f32 %v445_v55, 0.0 }
 0x118   :  { %v447_v58 = vpop.f32.mrf.mxu0  ;;  %v2453_v59 = vpop.f32.mrf.mxu1 }
 0x119   :  { %v448_v62 = vadd.f32 %v2446_v52, %v447_v58  ;;  %v702_v63 = vmax.f32 %v456_v56, 0.0 }
 0x11a   :  { %v1959_v0 = vpop.f32.mrf.mxu0  ;;  %v2456_v1 = vpop.f32.mrf.mxu1 }
 0x11b   :  { %v700_v3 = vmax.f32 %v448_v62, 0.0  ;;  %v764_v9 = vpack.c.bf16 %v702_v63, %v701_v4  ;;  %v469_v14 = vadd.f32 %v1959_v0, %v2446_v52 }
 0x11c   :  { %v460_v5 = vpop.f32.mrf.mxu0  ;;  %v2458_v6 = vpop.f32.mrf.mxu1 }
 0x11d   :  { %v763_v8 = vpack.c.bf16 %v700_v3, %v699_v2  ;;  %v461_v12 = vadd.f32 %v2446_v52, %v460_v5  ;;  %v705_v23 = vmax.f32 %v469_v14, 0.0 }
 0x11e   :  { %v1960_v10 = vpop.f32.mrf.mxu0  ;;  %v2460_v11 = vpop.f32.mrf.mxu1 }
 0x11f   :  { %v472_v13 = vadd.f32 %v1960_v10, %v2446_v52  ;;  %2033 = vmatprep.mubr.bf16.mxu1 %v763_v8  ;;  %v703_v21 = vmax.f32 %v461_v12, 0.0 }
 0x120   :  { %v463_v15 = vpop.f32.mrf.mxu0  ;;  %2034 = vmatmul.mubr.bf16.vlgmr.msra.gmra.mxu1 %v764_v9  ;;  %v2466_v20 = vpop.f32.mrf.mxu1 }
 0x121   :  { %v464_v17 = vadd.f32 %v2446_v52, %v463_v15  ;;  %v706_v18 = vmax.f32 %v472_v13, 0.0 }
 0x122   :  { %v1963_v19 = vpop.f32.mrf.mxu0  ;;  %v2468_v29 = vpop.f32.mrf.mxu1 }
 0x123   :  { %v704_v22 = vmax.f32 %v464_v17, 0.0  ;;  %v766_v27 = vpack.c.bf16 %v706_v18, %v705_v23  ;;  %v485_v32 = vadd.f32 %v1963_v19, %v2446_v52 }
 0x124   :  { %v476_v24 = vpop.f32.mrf.mxu0  ;;  %v2474_v38 = vpop.f32.mrf.mxu1 }
 0x125   :  { %v765_v26 = vpack.c.bf16 %v704_v22, %v703_v21  ;;  %v477_v30 = vadd.f32 %v2446_v52, %v476_v24  ;;  %v709_v41 = vmax.f32 %v485_v32, 0.0 }
 0x126   :  { %v1964_v28 = vpop.f32.mrf.mxu0  ;;  %v2476_v47 = vpop.f32.mrf.mxu1 }
 0x127   :  { %v488_v31 = vadd.f32 %v1964_v28, %v2446_v52  ;;  %2037 = vmatprep.mubr.bf16.mxu1 %v765_v26  ;;  %v707_v39 = vmax.f32 %v477_v30, 0.0 }
 0x128   :  { %v479_v33 = vpop.f32.mrf.mxu0  ;;  %2038 = vmatmul.mubr.bf16.gmra.mxu1 %v766_v27  ;;  %v2482_v60 = vpop.f32.mrf.mxu1 }
 0x129   :  { %v480_v35 = vadd.f32 %v2446_v52, %v479_v33  ;;  %v710_v36 = vmax.f32 %v488_v31, 0.0 }
 0x12a   :  { %v1967_v37 = vpop.f32.mrf.mxu0  ;;  %v2484_v5 = vpop.f32.mrf.mxu1 }
 0x12b   :  { %v708_v40 = vmax.f32 %v480_v35, 0.0  ;;  %v768_v45 = vpack.c.bf16 %v710_v36, %v709_v41  ;;  %v501_v53 = vadd.f32 %v1967_v37, %v2446_v52 }
 0x12c   :  { %v492_v42 = vpop.f32.mrf.mxu0  ;;  %v2490_v15 = vpop.f32.mrf.mxu1 }
 0x12d   :  { %v767_v44 = vpack.c.bf16 %v708_v40, %v707_v39  ;;  %v493_v48 = vadd.f32 %v2446_v52, %v492_v42  ;;  %v713_v63 = vmax.f32 %v501_v53, 0.0 }
 0x12e   :  { %v1968_v46 = vpop.f32.mrf.mxu0  ;;  %v2492_v24 = vpop.f32.mrf.mxu1 }
 0x12f   :  { %v504_v50 = vadd.f32 %v1968_v46, %v2446_v52  ;;  %2041 = vmatprep.mubr.bf16.mxu1 %v767_v44  ;;  %v711_v61 = vmax.f32 %v493_v48, 0.0 }
 0x130   :  { %v495_v55 = vpop.f32.mrf.mxu0  ;;  %2042 = vmatmul.mubr.bf16.gmra.mxu1 %v768_v45  ;;  %v2498_v33 = vpop.f32.mrf.mxu1 }
 0x131   :  { %v496_v56 = vadd.f32 %v2446_v52, %v495_v55  ;;  %v714_v57 = vmax.f32 %v504_v50, 0.0 }
 0x132   :  { %v1971_v58 = vpop.f32.mrf.mxu0  ;;  %v2500_v42 = vpop.f32.mrf.mxu1 }
 0x133   :  { %v712_v62 = vmax.f32 %v496_v56, 0.0  ;;  %v770_v3 = vpack.c.bf16 %v714_v57, %v713_v63  ;;  %v517_v9 = vadd.f32 %v1971_v58, %v2446_v52  ;;  %v573_v63 = vadd.f32 %v2446_v52, %v2441_v51 }
 0x134   :  { %v508_v0 = vpop.f32.mrf.mxu0  ;;  %v2506_v55 = vpop.f32.mrf.mxu1 }
 0x135   :  { %v769_v2 = vpack.c.bf16 %v712_v62, %v711_v61  ;;  %v509_v7 = vadd.f32 %v2446_v52, %v508_v0  ;;  %v717_v18 = vmax.f32 %v517_v9, 0.0  ;;  %v576_v0 = vadd.f32 %v2446_v52, %v2453_v59 }
 0x136   :  { %v1972_v4 = vpop.f32.mrf.mxu0 }
 0x137   :  { %v520_v8 = vadd.f32 %v1972_v4, %v2446_v52  ;;  %2045 = vmatprep.mubr.bf16.mxu1 %v769_v2  ;;  %v715_v16 = vmax.f32 %v509_v7, 0.0  ;;  %v2512_v4 = vpop.f32.mrf.mxu1  ;;  %v732_v51 = vmax.f32 %v576_v0, 0.0  ;;  %v632_v0 = vadd.f32 %v2492_v24, %v2446_v52 }
 0x138   :  { %v511_v10 = vpop.f32.mrf.mxu0  ;;  %2046 = vmatmul.mubr.bf16.gmra.mxu1 %v770_v3  ;;  %v648_v24 = vadd.f32 %v2512_v4, %v2446_v52 }
 0x139   :  { %v512_v12 = vadd.f32 %v2446_v52, %v511_v10  ;;  %v718_v13 = vmax.f32 %v520_v8, 0.0 }
 0x13a   :  { %v1975_v14 = vpop.f32.mrf.mxu0 }
 0x13b   :  { %v716_v17 = vmax.f32 %v512_v12, 0.0  ;;  %v772_v22 = vpack.c.bf16 %v718_v13, %v717_v18  ;;  %v533_v27 = vadd.f32 %v1975_v14, %v2446_v52  ;;  %v731_v12 = vmax.f32 %v573_v63, 0.0 }
 0x13c   :  { %v524_v19 = vpop.f32.mrf.mxu0 }
 0x13d   :  { %v771_v21 = vpack.c.bf16 %v716_v17, %v715_v16  ;;  %v525_v25 = vadd.f32 %v2446_v52, %v524_v19  ;;  %v721_v36 = vmax.f32 %v533_v27, 0.0  ;;  %v639_v16 = vpop.f32.mrf.mxu1  ;;  %v584_v27 = vadd.f32 %v2448_v54, %v2446_v52 }
 0x13e   :  { %v1976_v23 = vpop.f32.mrf.mxu0  ;;  %v597_v54 = vadd.f32 %v2456_v1, %v2446_v52  ;;  %v613_v1 = vadd.f32 %v2468_v29, %v2446_v52  ;;  %v640_v29 = vadd.f32 %v2446_v52, %v639_v16 }
 0x13f   :  { %v536_v26 = vadd.f32 %v1976_v23, %v2446_v52  ;;  %2049 = vmatprep.mubr.bf16.mxu1 %v771_v21  ;;  %v719_v34 = vmax.f32 %v525_v25, 0.0  ;;  %v779_v21 = vpack.c.bf16 %v732_v51, %v731_v12  ;;  %v592_v23 = vadd.f32 %v2446_v52, %v2466_v20 }
 0x140   :  { %v527_v28 = vpop.f32.mrf.mxu0  ;;  %2050 = vmatmul.mubr.bf16.gmra.mxu1 %v772_v22  ;;  %v589_v22 = vadd.f32 %v2446_v52, %v2458_v6  ;;  %v581_v25 = vadd.f32 %v2439_v49, %v2446_v52  ;;  %v605_v20 = vadd.f32 %v2446_v52, %v2474_v38  ;;  %v608_v49 = vadd.f32 %v2446_v52, %v2482_v60 }
 0x141   :  { %v528_v30 = vadd.f32 %v2446_v52, %v527_v28  ;;  %v722_v31 = vmax.f32 %v536_v26, 0.0  ;;  %v2526_v28 = vpop.f32.mrf.mxu1  ;;  %v621_v38 = vadd.f32 %v2446_v52, %v2490_v15  ;;  %v624_v60 = vadd.f32 %v2446_v52, %v2498_v33 }
 0x142   :  { %v1979_v32 = vpop.f32.mrf.mxu0  ;;  %v637_v33 = vadd.f32 %v2446_v52, %v2506_v55 }
 0x143   :  { %v720_v35 = vmax.f32 %v528_v30, 0.0  ;;  %v774_v40 = vpack.c.bf16 %v722_v31, %v721_v36  ;;  %v549_v45 = vadd.f32 %v1979_v32, %v2446_v52  ;;  %v735_v30 = vmax.f32 %v589_v22, 0.0  ;;  %v652_v6 = vpop.f32.mrf.mxu1 }
 0x144   :  { %v540_v37 = vpop.f32.mrf.mxu0  ;;  %v736_v31 = vmax.f32 %v592_v23, 0.0  ;;  %v733_v32 = vmax.f32 %v581_v25, 0.0  ;;  %v653_v55 = vadd.f32 %v2446_v52, %v652_v6 }
 0x145   :  { %v773_v39 = vpack.c.bf16 %v720_v35, %v719_v34  ;;  %v541_v43 = vadd.f32 %v2446_v52, %v540_v37  ;;  %v725_v58 = vmax.f32 %v549_v45, 0.0  ;;  %v734_v34 = vmax.f32 %v584_v27, 0.0 }
 0x146   :  { %v1980_v41 = vpop.f32.mrf.mxu0  ;;  %v781_v35 = vpack.c.bf16 %v736_v31, %v735_v30  ;;  %v600_v37 = vadd.f32 %v2460_v11, %v2446_v52  ;;  %v616_v11 = vadd.f32 %v2476_v47, %v2446_v52  ;;  %v629_v47 = vadd.f32 %v2484_v5, %v2446_v52 }
 0x147   :  { %v552_v44 = vadd.f32 %v1980_v41, %v2446_v52  ;;  %2053 = vmatprep.mubr.bf16.mxu1 %v773_v39  ;;  %v723_v56 = vmax.f32 %v541_v43, 0.0  ;;  %v780_v36 = vpack.c.bf16 %v734_v34, %v733_v32  ;;  %v2008_v39 = vpop.f32.mrf.mxu1  ;;  %v740_v41 = vmax.f32 %v608_v49, 0.0 }
 0x148   :  { %v543_v46 = vpop.f32.mrf.mxu0  ;;  %2054 = vmatmul.mubr.bf16.gmra.mxu1 %v774_v40  ;;  %v739_v40 = vmax.f32 %v605_v20, 0.0  ;;  %v737_v43 = vmax.f32 %v597_v54, 0.0  ;;  %v645_v5 = vadd.f32 %v2500_v42, %v2446_v52  ;;  %v751_v16 = vmax.f32 %v653_v55, 0.0 }
 0x149   :  { %v544_v48 = vadd.f32 %v2446_v52, %v543_v46  ;;  %v726_v50 = vmax.f32 %v552_v44, 0.0  ;;  %v738_v44 = vmax.f32 %v600_v37, 0.0  ;;  %v655_v45 = vpop.f32.mrf.mxu1  ;;  %v661_v42 = vadd.f32 %v2526_v28, %v2446_v52 }
 0x14a   :  { %v1983_v53 = vpop.f32.mrf.mxu0  ;;  %v783_v46 = vpack.c.bf16 %v740_v41, %v739_v40 }
 0x14b   :  { %v724_v57 = vmax.f32 %v544_v48, 0.0  ;;  %v776_v2 = vpack.c.bf16 %v726_v50, %v725_v58  ;;  %v565_v9 = vadd.f32 %v1983_v53, %v2446_v52  ;;  %v782_v48 = vpack.c.bf16 %v738_v44, %v737_v43  ;;  %v2011_v50 = vpop.f32.mrf.mxu1  ;;  %v2257_v53 = vld [vmem:[#allocation8] sm:$0xff]  }
 0x14c   :  { %v556_v61 = vpop.f32.mrf.mxu0  ;;  %v741_v58 = vmax.f32 %v613_v1, 0.0  ;;  %2111 = vmatprep.subr.bf16.mxu0 %v2257_v53  ;;  %v753_v31 = vmax.f32 %v661_v42, 0.0 }
 0x14d   :  { %v775_v62 = vpack.c.bf16 %v724_v57, %v723_v56  ;;  %v557_v7 = vadd.f32 %v2446_v52, %v556_v61  ;;  %v729_v18 = vmax.f32 %v565_v9, 0.0  ;;  %v743_v56 = vmax.f32 %v621_v38, 0.0  ;;  %2112 = vmatpush3.bf16.msra.mxu0 %v2257_v53 }
 0x14e   :  { %v1984_v3 = vpop.f32.mrf.mxu0  ;;  %v744_v57 = vmax.f32 %v624_v60, 0.0  ;;  %v742_v61 = vmax.f32 %v616_v11, 0.0  ;;  %v746_v9 = vmax.f32 %v632_v0, 0.0  ;;  %v2571_v11 = vld [vmem:[%s3161_s4] ss:$0 sm:$0xff] }
 0x14f   :  { %v568_v8 = vadd.f32 %v1984_v3, %v2446_v52  ;;  %2057 = vmatprep.mubr.bf16.mxu1 %v775_v62  ;;  %v727_v59 = vmax.f32 %v557_v7, 0.0  ;;  %v668_v62 = vpop.f32.mrf.mxu1  ;;  %v747_v3 = vmax.f32 %v637_v33, 0.0  ;;  %v748_v7 = vmax.f32 %v640_v29, 0.0 }
 0x150   :  { %v559_v10 = vpop.f32.mrf.mxu0  ;;  %2058 = vmatmul.mubr.bf16.gmra.mxu1 %v776_v2  ;;  %v785_v15 = vpack.c.bf16 %v744_v57, %v743_v56  ;;  %v784_v63 = vpack.c.bf16 %v742_v61, %v741_v58  ;;  %v669_v22 = vadd.f32 %v2446_v52, %v668_v62 }
 0x151   :  { %v560_v13 = vadd.f32 %v2446_v52, %v559_v10  ;;  %v730_v14 = vmax.f32 %v568_v8, 0.0  ;;  %v2012_v2 = vpop.f32.mrf.mxu1  ;;  %v745_v8 = vmax.f32 %v629_v47, 0.0  ;;  %v787_v12 = vpack.c.bf16 %v748_v7, %v747_v3 }
 0x152   :  { %v755_v27 = vmax.f32 %v669_v22, 0.0  ;;  %v680_v28 = vadd.f32 %v2012_v2, %v2446_v52 }
 0x153   :  { %v728_v17 = vmax.f32 %v560_v13, 0.0  ;;  %v778_v26 = vpack.c.bf16 %v730_v14, %v729_v18  ;;  %v671_v10 = vpop.f32.mrf.mxu1  ;;  %v656_v13 = vadd.f32 %v2446_v52, %v655_v45  ;;  %v786_v51 = vpack.c.bf16 %v746_v9, %v745_v8 }
 0x154   :  { %v750_v18 = vmax.f32 %v648_v24, 0.0  ;;  %v672_v23 = vadd.f32 %v2446_v52, %v671_v10  ;;  %v758_v40 = vmax.f32 %v680_v28, 0.0 }
 0x155   :  { %v777_v19 = vpack.c.bf16 %v728_v17, %v727_v59  ;;  %v2015_v14 = vpop.f32.mrf.mxu1  ;;  %v752_v59 = vmax.f32 %v656_v13, 0.0  ;;  %v749_v17 = vmax.f32 %v645_v5, 0.0 }
 0x156   :  { %v756_v30 = vmax.f32 %v672_v23, 0.0  ;;  %v693_v44 = vadd.f32 %v2015_v14, %v2446_v52 }
 0x157   :  { %2061 = vmatprep.mubr.bf16.mxu1 %v777_v19  ;;  %v684_v19 = vpop.f32.mrf.mxu1  ;;  %v788_v25 = vpack.c.bf16 %v750_v18, %v749_v17 }
 0x158   :  { %2062 = vmatmul.mubr.bf16.gmra.mxu1 %v778_v26  ;;  %v664_v26 = vadd.f32 %v2008_v39, %v2446_v52  ;;  %v791_v6 = vpack.c.bf16 %v756_v30, %v755_v27 }
 0x159   :  { %2065 = vmatprep.mubr.bf16.mxu1 %v779_v21  ;;  %v789_v21 = vpack.c.bf16 %v752_v59, %v751_v16  ;;  %v2016_v4 = vpop.f32.mrf.mxu1 }
 0x15a   :  { %v754_v32 = vmax.f32 %v664_v26, 0.0  ;;  %v696_v45 = vadd.f32 %v2016_v4, %v2446_v52 }
 0x15b   :  { %v687_v34 = vpop.f32.mrf.mxu1 }
 0x15c   :  { %v688_v20 = vadd.f32 %v2446_v52, %v687_v34  ;;  %v790_v49 = vpack.c.bf16 %v754_v32, %v753_v31  ;;  %v762_v38 = vmax.f32 %v696_v45, 0.0 }
 0x15e   :  { %v760_v37 = vmax.f32 %v688_v20, 0.0 }
 0x160   :  { %2066 = vmatmul.mubr.bf16.gmra.mxu1 %v780_v36  ;;  %v677_v36 = vadd.f32 %v2011_v50, %v2446_v52 }
 0x161   :  { %2069 = vmatprep.mubr.bf16.mxu1 %v781_v35  ;;  %v685_v35 = vadd.f32 %v2446_v52, %v684_v19 }
 0x162   :  { %v757_v39 = vmax.f32 %v677_v36, 0.0 }
 0x163   :  { %v759_v54 = vmax.f32 %v685_v35, 0.0 }
 0x164   :  { %v792_v43 = vpack.c.bf16 %v758_v40, %v757_v39 }
 0x165   :  { %v793_v41 = vpack.c.bf16 %v760_v37, %v759_v54 }
 0x168   :  { %2070 = vmatmul.mubr.bf16.gmra.mxu1 %v782_v48 }
 0x169   :  { %2073 = vmatprep.mubr.bf16.mxu1 %v783_v46  ;;  %v761_v46 = vmax.f32 %v693_v44, 0.0 }
 0x16b   :  { %v794_v60 = vpack.c.bf16 %v762_v38, %v761_v46 }
 0x170   :  { %2074 = vmatmul.mubr.bf16.gmra.mxu1 %v784_v63 }
 0x171   :  { %2077 = vmatprep.mubr.bf16.mxu1 %v785_v15 }
 0x178   :  { %2078 = vmatmul.mubr.bf16.gmra.mxu1 %v786_v51 }
 0x179   :  { %2081 = vmatprep.mubr.bf16.mxu1 %v787_v12 }
 0x180   :  { %2082 = vmatmul.mubr.bf16.gmra.mxu1 %v788_v25 }
 0x181   :  { %2085 = vmatprep.mubr.bf16.mxu1 %v789_v21 }
 0x188   :  { %2086 = vmatmul.mubr.bf16.gmra.mxu1 %v790_v49 }
 0x189   :  { %2089 = vmatprep.mubr.bf16.mxu1 %v791_v6 }
 0x190   :  { %2090 = vmatmul.mubr.bf16.gmra.mxu1 %v792_v43 }
 0x191   :  { %2093 = vmatprep.mubr.bf16.mxu1 %v793_v41 }
 0x198   :  { %2094 = vmatmul.mubr.bf16.gmra.mxu1 %v794_v60 }
 0x1e0   :  { %v2035_v48 = vpop.f32.mrf.mxu1 }
 0x1e1   :  { %v2580_v52 = vadd.f32 %v2035_v48, %v2571_v11 }
 0x1e2   :  { %v900_v1 = vpop.f32.mrf.mxu1 }
 0x1e3   :  { %v2574_v53 = vadd.f32 %v2571_v11, %v900_v1  ;;  %v3212_v29 = vmax.f32 %v2580_v52, 0.0 }
 0x1e4   :  { %v2036_v50 = vpop.f32.mrf.mxu1 }
 0x1e5   :  { %v2577_v56 = vadd.f32 %v2036_v50, %v2571_v11  ;;  %v3209_v15 = vmax.f32 %v2574_v53, 0.0 }
 0x1e6   :  { %v903_v57 = vpop.f32.mrf.mxu1 }
 0x1e7   :  { %v2583_v58 = vadd.f32 %v2571_v11, %v903_v57  ;;  %v3206_v61 = vmax.f32 %v2577_v56, 0.0 }
 0x1e8   :  { %v2039_v62 = vpop.f32.mrf.mxu1 }
 0x1e9   :  { %v3205_v33 = vmax.f32 %v2583_v58, 0.0  ;;  %v1220_v0 = vpack.c.bf16 %v3206_v61, %v3212_v29  ;;  %v2604_v8 = vadd.f32 %v2039_v62, %v2571_v11 }
 0x1ea   :  { %v916_v63 = vpop.f32.mrf.mxu1 }
 0x1eb   :  { %v1219_v47 = vpack.c.bf16 %v3205_v33, %v3209_v15  ;;  %v2598_v3 = vadd.f32 %v2571_v11, %v916_v63  ;;  %v3204_v5 = vmax.f32 %v2604_v8, 0.0 }
 0x1ec   :  { %v2040_v2 = vpop.f32.mrf.mxu1 }
 0x1ed   :  { %v2601_v7 = vadd.f32 %v2040_v2, %v2571_v11  ;;  %2113 = vmatprep.mubr.bf16.mxu0 %v1219_v47  ;;  %v3201_v13 = vmax.f32 %v2598_v3, 0.0 }
 0x1ee   :  { %v919_v9 = vpop.f32.mrf.mxu1  ;;  %2114 = vmatmul.mubr.bf16.vlgmr.msra.gmra.mxu0 %v1220_v0 }
 0x1ef   :  { %v2607_v10 = vadd.f32 %v2571_v11, %v919_v9  ;;  %v3198_v12 = vmax.f32 %v2601_v7, 0.0 }
 0x1f0   :  { %v2043_v55 = vpop.f32.mrf.mxu1 }
 0x1f1   :  { %v3197_v51 = vmax.f32 %v2607_v10, 0.0  ;;  %v1222_v16 = vpack.c.bf16 %v3198_v12, %v3204_v5  ;;  %v2628_v19 = vadd.f32 %v2043_v55, %v2571_v11 }
 0x1f2   :  { %v932_v24 = vpop.f32.mrf.mxu1 }
 0x1f3   :  { %v1221_v14 = vpack.c.bf16 %v3197_v51, %v3201_v13  ;;  %v2622_v17 = vadd.f32 %v2571_v11, %v932_v24  ;;  %v3196_v4 = vmax.f32 %v2628_v19, 0.0 }
 0x1f4   :  { %v2044_v59 = vpop.f32.mrf.mxu1 }
 0x1f5   :  { %v2625_v18 = vadd.f32 %v2044_v59, %v2571_v11  ;;  %2117 = vmatprep.mubr.bf16.mxu0 %v1221_v14  ;;  %v3193_v42 = vmax.f32 %v2622_v17, 0.0 }
 0x1f6   :  { %v935_v21 = vpop.f32.mrf.mxu1  ;;  %2118 = vmatmul.mubr.bf16.gmra.mxu0 %v1222_v16 }
 0x1f7   :  { %v2631_v22 = vadd.f32 %v2571_v11, %v935_v21  ;;  %v3190_v23 = vmax.f32 %v2625_v18, 0.0 }
 0x1f8   :  { %v2047_v25 = vpop.f32.mrf.mxu1 }
 0x1f9   :  { %v3189_v26 = vmax.f32 %v2631_v22, 0.0  ;;  %v1224_v31 = vpack.c.bf16 %v3190_v23, %v3196_v4  ;;  %v2652_v35 = vadd.f32 %v2047_v25, %v2571_v11 }
 0x1fa   :  { %v948_v27 = vpop.f32.mrf.mxu1 }
 0x1fb   :  { %v1223_v30 = vpack.c.bf16 %v3189_v26, %v3193_v42  ;;  %v2646_v34 = vadd.f32 %v2571_v11, %v948_v27  ;;  %v3188_v39 = vmax.f32 %v2652_v35, 0.0 }
 0x1fc   :  { %v2048_v32 = vpop.f32.mrf.mxu1 }
 0x1fd   :  { %v2649_v6 = vadd.f32 %v2048_v32, %v2571_v11  ;;  %2121 = vmatprep.mubr.bf16.mxu0 %v1223_v30  ;;  %v3185_v54 = vmax.f32 %v2646_v34, 0.0 }
 0x1fe   :  { %v951_v20 = vpop.f32.mrf.mxu1  ;;  %2122 = vmatmul.mubr.bf16.gmra.mxu0 %v1224_v31 }
 0x1ff   :  { %v2655_v49 = vadd.f32 %v2571_v11, %v951_v20  ;;  %v3182_v36 = vmax.f32 %v2649_v6, 0.0 }
 0x200   :  { %v2051_v28 = vpop.f32.mrf.mxu1 }
 0x201   :  { %v3181_v37 = vmax.f32 %v2655_v49, 0.0  ;;  %v1226_v43 = vpack.c.bf16 %v3182_v36, %v3188_v39  ;;  %v2676_v38 = vadd.f32 %v2051_v28, %v2571_v11 }
 0x202   :  { %v964_v40 = vpop.f32.mrf.mxu1 }
 0x203   :  { %v1225_v41 = vpack.c.bf16 %v3181_v37, %v3185_v54  ;;  %v2670_v45 = vadd.f32 %v2571_v11, %v964_v40  ;;  %v3180_v63 = vmax.f32 %v2676_v38, 0.0 }
 0x204   :  { %v2052_v44 = vpop.f32.mrf.mxu1 }
 0x205   :  { %v2673_v46 = vadd.f32 %v2052_v44, %v2571_v11  ;;  %2125 = vmatprep.mubr.bf16.mxu0 %v1225_v41  ;;  %v3177_v57 = vmax.f32 %v2670_v45, 0.0 }
 0x206   :  { %v967_v60 = vpop.f32.mrf.mxu1  ;;  %2126 = vmatmul.mubr.bf16.gmra.mxu0 %v1226_v43 }
 0x207   :  { %v2679_v48 = vadd.f32 %v2571_v11, %v967_v60  ;;  %v3174_v1 = vmax.f32 %v2673_v46, 0.0 }
 0x208   :  { %v2055_v50 = vpop.f32.mrf.mxu1 }
 0x209   :  { %v3173_v62 = vmax.f32 %v2679_v48, 0.0  ;;  %v1228_v2 = vpack.c.bf16 %v3174_v1, %v3180_v63  ;;  %v2700_v14 = vadd.f32 %v2055_v50, %v2571_v11 }
 0x20a   :  { %v980_v47 = vpop.f32.mrf.mxu1 }
 0x20b   :  { %v1227_v0 = vpack.c.bf16 %v3173_v62, %v3177_v57  ;;  %v2694_v55 = vadd.f32 %v2571_v11, %v980_v47  ;;  %v3172_v31 = vmax.f32 %v2700_v14, 0.0 }
 0x20c   :  { %v2056_v9 = vpop.f32.mrf.mxu1 }
 0x20d   :  { %v2697_v24 = vadd.f32 %v2056_v9, %v2571_v11  ;;  %2129 = vmatprep.mubr.bf16.mxu0 %v1227_v0  ;;  %v3169_v27 = vmax.f32 %v2694_v55, 0.0 }
 0x20e   :  { %v983_v16 = vpop.f32.mrf.mxu1  ;;  %2130 = vmatmul.mubr.bf16.gmra.mxu0 %v1228_v2 }
 0x20f   :  { %v2703_v59 = vadd.f32 %v2571_v11, %v983_v16  ;;  %v3166_v21 = vmax.f32 %v2697_v24, 0.0 }
 0x210   :  { %v2059_v25 = vpop.f32.mrf.mxu1 }
 0x211   :  { %v3165_v30 = vmax.f32 %v2703_v59, 0.0  ;;  %v1230_v28 = vpack.c.bf16 %v3166_v21, %v3172_v31  ;;  %v2724_v44 = vadd.f32 %v2059_v25, %v2571_v11 }
 0x212   :  { %v996_v32 = vpop.f32.mrf.mxu1 }
 0x213   :  { %v1229_v20 = vpack.c.bf16 %v3165_v30, %v3169_v27  ;;  %v2718_v41 = vadd.f32 %v2571_v11, %v996_v32  ;;  %v3171_v16 = vmax.f32 %v2724_v44, 0.0 }
 0x214   :  { %v2060_v40 = vpop.f32.mrf.mxu1 }
 0x215   :  { %v2721_v43 = vadd.f32 %v2060_v40, %v2571_v11  ;;  %2133 = vmatprep.mubr.bf16.mxu0 %v1229_v20  ;;  %v3168_v2 = vmax.f32 %v2718_v41, 0.0 }
 0x216   :  { %v999_v60 = vpop.f32.mrf.mxu1  ;;  %2134 = vmatmul.mubr.bf16.gmra.mxu0 %v1230_v28 }
 0x217   :  { %v2727_v50 = vadd.f32 %v2571_v11, %v999_v60  ;;  %v3170_v47 = vmax.f32 %v2721_v43, 0.0 }
 0x218   :  { %v2063_v0 = vpop.f32.mrf.mxu1 }
 0x219   :  { %v3167_v9 = vmax.f32 %v2727_v50, 0.0  ;;  %v1232_v20 = vpack.c.bf16 %v3170_v47, %v3171_v16  ;;  %v2748_v30 = vadd.f32 %v2063_v0, %v2571_v11 }
 0x21a   :  { %v1012_v32 = vpop.f32.mrf.mxu1 }
 0x21b   :  { %v1231_v25 = vpack.c.bf16 %v3167_v9, %v3168_v2  ;;  %v2742_v40 = vadd.f32 %v2571_v11, %v1012_v32  ;;  %v3179_v16 = vmax.f32 %v2748_v30, 0.0 }
 0x21c   :  { %v2064_v28 = vpop.f32.mrf.mxu1 }
 0x21d   :  { %v2745_v60 = vadd.f32 %v2064_v28, %v2571_v11  ;;  %2137 = vmatprep.mubr.bf16.mxu0 %v1231_v25  ;;  %v3176_v47 = vmax.f32 %v2742_v40, 0.0 }
 0x21e   :  { %v1015_v21 = vpop.f32.mrf.mxu1  ;;  %2138 = vmatmul.mubr.bf16.gmra.mxu0 %v1232_v20 }
 0x21f   :  { %v2751_v9 = vadd.f32 %v2571_v11, %v1015_v21  ;;  %v3178_v2 = vmax.f32 %v2745_v60, 0.0 }
 0x220   :  { %v2067_v27 = vpop.f32.mrf.mxu1 }
 0x221   :  { %v3175_v32 = vmax.f32 %v2751_v9, 0.0  ;;  %v1234_v21 = vpack.c.bf16 %v3178_v2, %v3179_v16  ;;  %v2772_v62 = vadd.f32 %v2067_v27, %v2571_v11 }
 0x222   :  { %v1028_v28 = vpop.f32.mrf.mxu1 }
 0x223   :  { %v1233_v0 = vpack.c.bf16 %v3175_v32, %v3176_v47  ;;  %v2766_v20 = vadd.f32 %v2571_v11, %v1028_v28  ;;  %v3187_v16 = vmax.f32 %v2772_v62, 0.0 }
 0x224   :  { %v2068_v25 = vpop.f32.mrf.mxu1 }
 0x225   :  { %v2769_v31 = vadd.f32 %v2068_v25, %v2571_v11  ;;  %2141 = vmatprep.mubr.bf16.mxu0 %v1233_v0  ;;  %v3184_v2 = vmax.f32 %v2766_v20, 0.0 }
 0x226   :  { %v1031_v1 = vpop.f32.mrf.mxu1  ;;  %2142 = vmatmul.mubr.bf16.gmra.mxu0 %v1234_v21 }
 0x227   :  { %v2775_v32 = vadd.f32 %v2571_v11, %v1031_v1  ;;  %v3186_v47 = vmax.f32 %v2769_v31, 0.0 }
 0x228   :  { %v2071_v57 = vpop.f32.mrf.mxu1 }
 0x229   :  { %v3183_v28 = vmax.f32 %v2775_v32, 0.0  ;;  %v1236_v1 = vpack.c.bf16 %v3186_v47, %v3187_v16  ;;  %v2796_v37 = vadd.f32 %v2071_v57, %v2571_v11 }
 0x22a   :  { %v1044_v25 = vpop.f32.mrf.mxu1 }
 0x22b   :  { %v1235_v27 = vpack.c.bf16 %v3183_v28, %v3184_v2  ;;  %v2790_v21 = vadd.f32 %v2571_v11, %v1044_v25  ;;  %v3195_v16 = vmax.f32 %v2796_v37, 0.0 }
 0x22c   :  { %v2072_v0 = vpop.f32.mrf.mxu1 }
 0x22d   :  { %v2793_v63 = vadd.f32 %v2072_v0, %v2571_v11  ;;  %2145 = vmatprep.mubr.bf16.mxu0 %v1235_v27  ;;  %v3192_v47 = vmax.f32 %v2790_v21, 0.0 }
 0x22e   :  { %v1047_v36 = vpop.f32.mrf.mxu1  ;;  %2146 = vmatmul.mubr.bf16.gmra.mxu0 %v1236_v1 }
 0x22f   :  { %v2799_v28 = vadd.f32 %v2571_v11, %v1047_v36  ;;  %v3194_v2 = vmax.f32 %v2793_v63, 0.0 }
 0x230   :  { %v2075_v54 = vpop.f32.mrf.mxu1 }
 0x231   :  { %v3191_v25 = vmax.f32 %v2799_v28, 0.0  ;;  %v1238_v36 = vpack.c.bf16 %v3194_v2, %v3195_v16  ;;  %v2820_v26 = vadd.f32 %v2075_v54, %v2571_v11 }
 0x232   :  { %v1060_v0 = vpop.f32.mrf.mxu1 }
 0x233   :  { %v1237_v57 = vpack.c.bf16 %v3191_v25, %v3192_v47  ;;  %v2814_v1 = vadd.f32 %v2571_v11, %v1060_v0  ;;  %v3203_v16 = vmax.f32 %v2820_v26, 0.0 }
 0x234   :  { %v2076_v27 = vpop.f32.mrf.mxu1 }
 0x235   :  { %v2817_v39 = vadd.f32 %v2076_v27, %v2571_v11  ;;  %2149 = vmatprep.mubr.bf16.mxu0 %v1237_v57  ;;  %v3200_v2 = vmax.f32 %v2814_v1, 0.0 }
 0x236   :  { %v1063_v23 = vpop.f32.mrf.mxu1  ;;  %2150 = vmatmul.mubr.bf16.gmra.mxu0 %v1238_v36 }
 0x237   :  { %v2823_v25 = vadd.f32 %v2571_v11, %v1063_v23  ;;  %v3202_v47 = vmax.f32 %v2817_v39, 0.0 }
 0x238   :  { %v2079_v42 = vpop.f32.mrf.mxu1 }
 0x239   :  { %v3199_v0 = vmax.f32 %v2823_v25, 0.0  ;;  %v1240_v23 = vpack.c.bf16 %v3202_v47, %v3203_v16  ;;  %v2844_v51 = vadd.f32 %v2079_v42, %v2571_v11 }
 0x23a   :  { %v1076_v27 = vpop.f32.mrf.mxu1 }
 0x23b   :  { %v1239_v54 = vpack.c.bf16 %v3199_v0, %v3200_v2  ;;  %v2838_v36 = vadd.f32 %v2571_v11, %v1076_v27  ;;  %v3211_v16 = vmax.f32 %v2844_v51, 0.0 }
 0x23c   :  { %v2080_v57 = vpop.f32.mrf.mxu1 }
 0x23d   :  { %v2841_v4 = vadd.f32 %v2080_v57, %v2571_v11  ;;  %2153 = vmatprep.mubr.bf16.mxu0 %v1239_v54  ;;  %v3208_v47 = vmax.f32 %v2838_v36, 0.0 }
 0x23e   :  { %v1079_v12 = vpop.f32.mrf.mxu1  ;;  %2154 = vmatmul.mubr.bf16.gmra.mxu0 %v1240_v23 }
 0x23f   :  { %v2847_v0 = vadd.f32 %v2571_v11, %v1079_v12  ;;  %v3210_v2 = vmax.f32 %v2841_v4, 0.0 }
 0x240   :  { %v2083_v13 = vpop.f32.mrf.mxu1 }
 0x241   :  { %3244 = vst [vmem:[#allocation15_spill] sm:$0xff] %v2847_v0  ;;  %v3207_v27 = vmax.f32 %v2847_v0, 0.0  ;;  %v1242_v12 = vpack.c.bf16 %v3210_v2, %v3211_v16  ;;  %v2868_v33 = vadd.f32 %v2083_v13, %v2571_v11 }
 0x242   :  { %v1092_v57 = vpop.f32.mrf.mxu1 }
 0x243   :  { %v1241_v42 = vpack.c.bf16 %v3207_v27, %v3208_v47  ;;  %v2862_v23 = vadd.f32 %v2571_v11, %v1092_v57  ;;  %3247 = vst [vmem:[#allocation18_spill] sm:$0xff] %v2868_v33  ;;  %v3219_v16 = vmax.f32 %v2868_v33, 0.0 }
 0x244   :  { %v2084_v54 = vpop.f32.mrf.mxu1 }
 0x245   :  { %3245 = vst [vmem:[#allocation16_spill] sm:$0xff] %v2862_v23  ;;  %v2865_v5 = vadd.f32 %v2084_v54, %v2571_v11  ;;  %2157 = vmatprep.mubr.bf16.mxu0 %v1241_v42  ;;  %v3216_v2 = vmax.f32 %v2862_v23, 0.0 }
 0x246   :  { %v1095_v61 = vpop.f32.mrf.mxu1  ;;  %2158 = vmatmul.mubr.bf16.gmra.mxu0 %v1242_v12 }
 0x247   :  { %3246 = vst [vmem:[#allocation17_spill] sm:$0xff] %v2865_v5  ;;  %v2871_v27 = vadd.f32 %v2571_v11, %v1095_v61  ;;  %v3218_v47 = vmax.f32 %v2865_v5, 0.0 }
 0x248   :  { %v2087_v15 = vpop.f32.mrf.mxu1 }
 0x249   :  { %3248 = vst [vmem:[#allocation19_spill] sm:$0xff] %v2871_v27  ;;  %v3215_v57 = vmax.f32 %v2871_v27, 0.0  ;;  %v1244_v61 = vpack.c.bf16 %v3218_v47, %v3219_v16  ;;  %v2892_v0 = vadd.f32 %v2087_v15, %v2571_v11 }
 0x24a   :  { %v1108_v54 = vpop.f32.mrf.mxu1 }
 0x24b   :  { %v1243_v13 = vpack.c.bf16 %v3215_v57, %v3216_v2  ;;  %v2886_v12 = vadd.f32 %v2571_v11, %v1108_v54  ;;  %3251 = vst [vmem:[#allocation22_spill] sm:$0xff] %v2892_v0  ;;  %v3227_v16 = vmax.f32 %v2892_v0, 0.0 }
 0x24c   :  { %v2088_v42 = vpop.f32.mrf.mxu1 }
 0x24d   :  { %3249 = vst [vmem:[#allocation20_spill] sm:$0xff] %v2886_v12  ;;  %v2889_v29 = vadd.f32 %v2088_v42, %v2571_v11  ;;  %2161 = vmatprep.mubr.bf16.mxu0 %v1243_v13  ;;  %v3224_v47 = vmax.f32 %v2886_v12, 0.0 }
 0x24e   :  { %v1111_v23 = vpop.f32.mrf.mxu1  ;;  %2162 = vmatmul.mubr.bf16.gmra.mxu0 %v1244_v61 }
 0x24f   :  { %3250 = vst [vmem:[#allocation21_spill] sm:$0xff] %v2889_v29  ;;  %v2895_v57 = vadd.f32 %v2571_v11, %v1111_v23  ;;  %v3226_v2 = vmax.f32 %v2889_v29, 0.0 }
 0x250   :  { %v2091_v27 = vpop.f32.mrf.mxu1 }
 0x251   :  { %3252 = vst [vmem:[#allocation23_spill] sm:$0xff] %v2895_v57  ;;  %v3223_v54 = vmax.f32 %v2895_v57, 0.0  ;;  %v1246_v23 = vpack.c.bf16 %v3226_v2, %v3227_v16  ;;  %v2916_v33 = vadd.f32 %v2091_v27, %v2571_v11 }
 0x252   :  { %v1124_v42 = vpop.f32.mrf.mxu1 }
 0x253   :  { %v1245_v15 = vpack.c.bf16 %v3223_v54, %v3224_v47  ;;  %v2910_v61 = vadd.f32 %v2571_v11, %v1124_v42  ;;  %v3234_v16 = vmax.f32 %v2916_v33, 0.0 }
 0x254   :  { %v2092_v13 = vpop.f32.mrf.mxu1 }
 0x255   :  { %3253 = vst [vmem:[#allocation24_spill] sm:$0xff] %v2910_v61  ;;  %v2913_v5 = vadd.f32 %v2092_v13, %v2571_v11  ;;  %2165 = vmatprep.mubr.bf16.mxu0 %v1245_v15  ;;  %v3232_v2 = vmax.f32 %v2910_v61, 0.0 }
 0x256   :  { %v1127_v12 = vpop.f32.mrf.mxu1  ;;  %2166 = vmatmul.mubr.bf16.gmra.mxu0 %v1246_v23 }
 0x257   :  { %v2919_v54 = vadd.f32 %v2571_v11, %v1127_v12  ;;  %v3233_v47 = vmax.f32 %v2913_v5, 0.0 }
 0x258   :  { %v2095_v57 = vpop.f32.mrf.mxu1 }
 0x259   :  { %3254 = vst [vmem:[#allocation25_spill] sm:$0xff] %v2919_v54  ;;  %v3231_v42 = vmax.f32 %v2919_v54, 0.0  ;;  %v1248_v12 = vpack.c.bf16 %v3233_v47, %v3234_v16  ;;  %v2940_v0 = vadd.f32 %v2095_v57, %v2571_v11 }
 0x25a   :  { %v1140_v13 = vpop.f32.mrf.mxu1 }
 0x25b   :  { %v1247_v27 = vpack.c.bf16 %v3231_v42, %v3232_v2  ;;  %v2934_v23 = vadd.f32 %v2571_v11, %v1140_v13  ;;  %3257 = vst [vmem:[#allocation28_spill] sm:$0xff] %v2940_v0  ;;  %v3240_v13 = vmax.f32 %v2940_v0, 0.0 }
 0x25c   :  { %v2096_v15 = vpop.f32.mrf.mxu1 }
 0x25d   :  { %3255 = vst [vmem:[#allocation26_spill] sm:$0xff] %v2934_v23  ;;  %v2937_v29 = vadd.f32 %v2096_v15, %v2571_v11  ;;  %2169 = vmatprep.mubr.bf16.mxu0 %v1247_v27  ;;  %v3238_v47 = vmax.f32 %v2934_v23, 0.0  ;;  %v3259_v23 = vmax.f32 %v2580_v52, 0.0  ;;  %v3262_v52 = vmax.f32 %v2583_v58, 0.0 }
 0x25e   :  { %v1143_v61 = vpop.f32.mrf.mxu1  ;;  %2170 = vmatmul.mubr.bf16.gmra.mxu0 %v1248_v12  ;;  %v3265_v58 = vmax.f32 %v2601_v7, 0.0  ;;  %v3268_v7 = vmax.f32 %v2622_v17, 0.0  ;;  %v3271_v17 = vmax.f32 %v2652_v35, 0.0  ;;  %v3274_v35 = vmax.f32 %v2655_v49, 0.0 }
 0x25f   :  { %3256 = vst [vmem:[#allocation27_spill] sm:$0xff] %v2937_v29  ;;  %v2943_v42 = vadd.f32 %v2571_v11, %v1143_v61  ;;  %v3239_v2 = vmax.f32 %v2937_v29, 0.0  ;;  %v2960_v11 = vld [vmem:[%s3163_s6] ss:$0 sm:$0xff]  ;;  %v3261_v29 = vmax.f32 %v2577_v56, 0.0  ;;  %v3264_v56 = vmax.f32 %v2598_v3, 0.0 }
 0x260   :  { %v3267_v3 = vmax.f32 %v2628_v19, 0.0  ;;  %v3270_v19 = vmax.f32 %v2631_v22, 0.0  ;;  %v3273_v22 = vmax.f32 %v2649_v6, 0.0  ;;  %v3276_v6 = vmax.f32 %v2670_v45, 0.0  ;;  %s2372_s6 = smov [#allocation10]  }
 0x261   :  { %3258 = vst [vmem:[#allocation29_spill] sm:$0xff] %v2943_v42  ;;  %v3237_v16 = vmax.f32 %v2943_v42, 0.0  ;;  %v1250_v57 = vpack.c.bf16 %v3239_v2, %v3240_v13  ;;  %v3260_v2 = vmax.f32 %v2574_v53, 0.0  ;;  %v3263_v53 = vmax.f32 %v2604_v8, 0.0  ;;  %s1744_s23 = sshll.u32 %s2372_s6, 4  ;;  %s1745_s23 = int_to_ptr.vmem [resolvable:$true] %s1744_s23 }
 0x262   :  { %v3266_v8 = vmax.f32 %v2607_v10, 0.0  ;;  %v3269_v10 = vmax.f32 %v2625_v18, 0.0  ;;  %v3272_v18 = vmax.f32 %v2646_v34, 0.0  ;;  %v3275_v34 = vmax.f32 %v2676_v38, 0.0  ;;  %s2338_s24 = scalar_lea.vmem %s1745_s23, 8192  ;;  %p2343_p7 = scmp.lt.s32.totalorder %s1745_s23, %s1745_s23 }
 0x263   :  { %v1249_v27 = vpack.c.bf16 %v3237_v16, %v3238_v47  ;;  %v3277_v49 = vmax.f32 %v2673_v46, 0.0  ;;  %v3278_v38 = vmax.f32 %v2679_v48, 0.0  ;;  %v3279_v45 = vmax.f32 %v2700_v14, 0.0  ;;  %p2339_p6 = scmp.ne.s32.totalorder %s1745_s23, %s2338_s24  ;;  %p2344_p8 = scmp.lt.s32.totalorder %s2338_s24, %s2338_s24 }
 0x264   :  { %v3280_v46 = vmax.f32 %v2694_v55, 0.0  ;;  %v3281_v48 = vmax.f32 %v2697_v24, 0.0  ;;  %v3282_v14 = vmax.f32 %v2703_v59, 0.0  ;;  %v3283_v55 = vmax.f32 %v2724_v44, 0.0 }
 0x265   :  { %2173 = vmatprep.mubr.bf16.mxu0 %v1249_v27  ;;  %v3284_v24 = vmax.f32 %v2718_v41, 0.0  ;;  %v3285_v59 = vmax.f32 %v2721_v43, 0.0  ;;  %v3286_v44 = vmax.f32 %v2727_v50, 0.0  ;;  %v3287_v41 = vmax.f32 %v2748_v30, 0.0  ;;  %p2345_p9 = por %p2344_p8, %p2343_p7 }
 0x266   :  { %2174 = vmatmul.mubr.bf16.gmra.mxu0 %v1250_v57  ;;  %v3288_v43 = vmax.f32 %v2742_v40, 0.0  ;;  %v3289_v50 = vmax.f32 %v2745_v60, 0.0  ;;  %v3290_v30 = vmax.f32 %v2751_v9, 0.0  ;;  %v3291_v40 = vmax.f32 %v2772_v62, 0.0 }
 0x267   :  { %v3292_v60 = vmax.f32 %v2766_v20, 0.0  ;;  %v3293_v9 = vmax.f32 %v2769_v31, 0.0  ;;  %v3294_v62 = vmax.f32 %v2775_v32, 0.0  ;;  %v3295_v20 = vmax.f32 %v2796_v37, 0.0  ;;  %p2346_p10 = pnand %p2345_p9, %p2339_p6 }
 0x268   :  { %v3296_v31 = vmax.f32 %v2790_v21, 0.0  ;;  %v3297_v32 = vmax.f32 %v2793_v63, 0.0  ;;  %v3298_v37 = vmax.f32 %v2799_v28, 0.0  ;;  %v3299_v21 = vmax.f32 %v2820_v26, 0.0 }
 0x269   :  { %v3300_v63 = vmax.f32 %v2814_v1, 0.0  ;;  %v3301_v28 = vmax.f32 %v2817_v39, 0.0  ;;  %v3302_v26 = vmax.f32 %v2823_v25, 0.0  ;;  %v3303_v1 = vmax.f32 %v2844_v51, 0.0  ;;  %v3306_v51 = vld [vmem:[#allocation15_spill] sm:$0xff] }
 0x26a   :  { %v3304_v39 = vmax.f32 %v2838_v36, 0.0  ;;  %v3305_v25 = vmax.f32 %v2841_v4, 0.0  ;;  %v3308_v36 = vld [vmem:[#allocation18_spill] sm:$0xff]  ;;  %v3310_v4 = vld [vmem:[#allocation16_spill] sm:$0xff] }
 0x2ae   :  { %v2115_v61 = vpop.f32.mrf.mxu0 }
 0x2af   :  { %v1365_v12 = vadd.f32 %v2115_v61, %v2960_v11 }
 0x2b0   :  { %v1356_v15 = vpop.f32.mrf.mxu0 }
 0x2b1   :  { %v1613_v42 = vadd.f32 %v1365_v12, %v3259_v23  ;;  %v1357_v16 = vadd.f32 %v2960_v11, %v1356_v15 }
 0x2b2   :  { %v2116_v47 = vpop.f32.mrf.mxu0 }
 0x2b3   :  { %1677 = vst [vmem:[#allocation10 + $0x10] sm:$0xff] %v1613_v42  ;;  %v1611_v27 = vadd.f32 %v1357_v16, %v3260_v2  ;;  %v1368_v57 = vadd.f32 %v2116_v47, %v2960_v11 }
 0x2b4   :  { %v1359_v13 = vpop.f32.mrf.mxu0 }
 0x2b5   :  { %1675 = vst [vmem:[#allocation10] sm:$0xff] %v1611_v27  ;;  %v1614_v0 = vadd.f32 %v1368_v57, %v3261_v29  ;;  %v1360_v61 = vadd.f32 %v2960_v11, %v1359_v13 }
 0x2b6   :  { %v2119_v54 = vpop.f32.mrf.mxu0 }
 0x2b7   :  { %1678 = vst [vmem:[#allocation10 + $0x18] sm:$0xff] %v1614_v0  ;;  %v1612_v23 = vadd.f32 %v1360_v61, %v3262_v52  ;;  %v1381_v12 = vadd.f32 %v2119_v54, %v2960_v11 }
 0x2b8   :  { %v1372_v42 = vpop.f32.mrf.mxu0 }
 0x2b9   :  { %1676 = vst [vmem:[#allocation10 + $0x8] sm:$0xff] %v1612_v23  ;;  %v1617_v2 = vadd.f32 %v1381_v12, %v3263_v53  ;;  %v1373_v47 = vadd.f32 %v2960_v11, %v1372_v42 }
 0x2ba   :  { %v2120_v16 = vpop.f32.mrf.mxu0 }
 0x2bb   :  { %1681 = vst [vmem:[#allocation10 + $0x30] sm:$0xff] %v1617_v2  ;;  %v1615_v29 = vadd.f32 %v1373_v47, %v3264_v56  ;;  %v1384_v13 = vadd.f32 %v2120_v16, %v2960_v11 }
 0x2bc   :  { %v1375_v0 = vpop.f32.mrf.mxu0 }
 0x2bd   :  { %1679 = vst [vmem:[#allocation10 + $0x20] sm:$0xff] %v1615_v29  ;;  %v1618_v15 = vadd.f32 %v1384_v13, %v3265_v58  ;;  %v1376_v54 = vadd.f32 %v2960_v11, %v1375_v0 }
 0x2be   :  { %v2123_v27 = vpop.f32.mrf.mxu0 }
 0x2bf   :  { %1682 = vst [vmem:[#allocation10 + $0x38] sm:$0xff] %v1618_v15  ;;  %v1616_v57 = vadd.f32 %v1376_v54, %v3266_v8  ;;  %v1397_v61 = vadd.f32 %v2123_v27, %v2960_v11 }
 0x2c0   :  { %v1388_v52 = vpop.f32.mrf.mxu0 }
 0x2c1   :  { %1680 = vst [vmem:[#allocation10 + $0x28] sm:$0xff] %v1616_v57  ;;  %v1621_v23 = vadd.f32 %v1397_v61, %v3267_v3  ;;  %v1389_v12 = vadd.f32 %v2960_v11, %v1388_v52 }
 0x2c2   :  { %v2124_v42 = vpop.f32.mrf.mxu0 }
 0x2c3   :  { %1685 = vst [vmem:[#allocation10 + $0x50] sm:$0xff] %v1621_v23  ;;  %v1619_v53 = vadd.f32 %v1389_v12, %v3268_v7  ;;  %v1400_v2 = vadd.f32 %v2124_v42, %v2960_v11 }
 0x2c4   :  { %v1391_v47 = vpop.f32.mrf.mxu0 }
 0x2c5   :  { %1683 = vst [vmem:[#allocation10 + $0x40] sm:$0xff] %v1619_v53  ;;  %v1622_v16 = vadd.f32 %v1400_v2, %v3269_v10  ;;  %v1392_v56 = vadd.f32 %v2960_v11, %v1391_v47 }
 0x2c6   :  { %v2127_v29 = vpop.f32.mrf.mxu0 }
 0x2c7   :  { %1686 = vst [vmem:[#allocation10 + $0x58] sm:$0xff] %v1622_v16  ;;  %v1620_v13 = vadd.f32 %v1392_v56, %v3270_v19  ;;  %v1413_v0 = vadd.f32 %v2127_v29, %v2960_v11 }
 0x2c8   :  { %v1404_v58 = vpop.f32.mrf.mxu0 }
 0x2c9   :  { %1684 = vst [vmem:[#allocation10 + $0x48] sm:$0xff] %v1620_v13  ;;  %v1625_v15 = vadd.f32 %v1413_v0, %v3271_v17  ;;  %v1405_v54 = vadd.f32 %v2960_v11, %v1404_v58 }
 0x2ca   :  { %v2128_v27 = vpop.f32.mrf.mxu0 }
 0x2cb   :  { %1689 = vst [vmem:[#allocation10 + $0x70] sm:$0xff] %v1625_v15  ;;  %v1623_v8 = vadd.f32 %v1405_v54, %v3272_v18  ;;  %v1416_v57 = vadd.f32 %v2128_v27, %v2960_v11 }
 0x2cc   :  { %v1407_v61 = vpop.f32.mrf.mxu0 }
 0x2cd   :  { %1687 = vst [vmem:[#allocation10 + $0x60] sm:$0xff] %v1623_v8  ;;  %v1626_v52 = vadd.f32 %v1416_v57, %v3273_v22  ;;  %v1408_v3 = vadd.f32 %v2960_v11, %v1407_v61 }
 0x2ce   :  { %v2131_v23 = vpop.f32.mrf.mxu0 }
 0x2cf   :  { %1690 = vst [vmem:[#allocation10 + $0x78] sm:$0xff] %v1626_v52  ;;  %v1624_v12 = vadd.f32 %v1408_v3, %v3274_v35  ;;  %v1429_v42 = vadd.f32 %v2131_v23, %v2960_v11 }
 0x2d0   :  { %v1420_v7 = vpop.f32.mrf.mxu0 }
 0x2d1   :  { %1688 = vst [vmem:[#allocation10 + $0x68] sm:$0xff] %v1624_v12  ;;  %v1629_v53 = vadd.f32 %v1429_v42, %v3275_v34  ;;  %v1421_v2 = vadd.f32 %v2960_v11, %v1420_v7 }
 0x2d2   :  { %v2132_v47 = vpop.f32.mrf.mxu0 }
 0x2d3   :  { %1693 = vst [vmem:[#allocation10 + $0x90] sm:$0xff] %v1629_v53  ;;  %v1627_v10 = vadd.f32 %v1421_v2, %v3276_v6  ;;  %v1432_v16 = vadd.f32 %v2132_v47, %v2960_v11 }
 0x2d4   :  { %v1423_v56 = vpop.f32.mrf.mxu0 }
 0x2d5   :  { %1691 = vst [vmem:[#allocation10 + $0x80] sm:$0xff] %v1627_v10  ;;  %v1630_v29 = vadd.f32 %v1432_v16, %v3277_v49  ;;  %v1424_v19 = vadd.f32 %v2960_v11, %v1423_v56 }
 0x2d6   :  { %v2135_v13 = vpop.f32.mrf.mxu0 }
 0x2d7   :  { %1694 = vst [vmem:[#allocation10 + $0x98] sm:$0xff] %v1630_v29  ;;  %v1628_v0 = vadd.f32 %v1424_v19, %v3278_v38  ;;  %v1445_v58 = vadd.f32 %v2135_v13, %v2960_v11 }
 0x2d8   :  { %v1436_v17 = vpop.f32.mrf.mxu0 }
 0x2d9   :  { %1692 = vst [vmem:[#allocation10 + $0x88] sm:$0xff] %v1628_v0  ;;  %v1633_v15 = vadd.f32 %v1445_v58, %v3279_v45  ;;  %v1437_v54 = vadd.f32 %v2960_v11, %v1436_v17 }
 0x2da   :  { %v2136_v27 = vpop.f32.mrf.mxu0 }
 0x2db   :  { %1697 = vst [vmem:[#allocation10 + $0xb0] sm:$0xff] %v1633_v15  ;;  %v1631_v18 = vadd.f32 %v1437_v54, %v3280_v46  ;;  %v1448_v8 = vadd.f32 %v2136_v27, %v2960_v11 }
 0x2dc   :  { %v1439_v57 = vpop.f32.mrf.mxu0 }
 0x2dd   :  { %1695 = vst [vmem:[#allocation10 + $0xa0] sm:$0xff] %v1631_v18  ;;  %v1634_v61 = vadd.f32 %v1448_v8, %v3281_v48  ;;  %v1440_v22 = vadd.f32 %v2960_v11, %v1439_v57 }
 0x2de   :  { %v2139_v52 = vpop.f32.mrf.mxu0 }
 0x2df   :  { %1698 = vst [vmem:[#allocation10 + $0xb8] sm:$0xff] %v1634_v61  ;;  %v1632_v3 = vadd.f32 %v1440_v22, %v3282_v14  ;;  %v1461_v23 = vadd.f32 %v2139_v52, %v2960_v11 }
 0x2e0   :  { %v1452_v35 = vpop.f32.mrf.mxu0 }
 0x2e1   :  { %1696 = vst [vmem:[#allocation10 + $0xa8] sm:$0xff] %v1632_v3  ;;  %v1637_v12 = vadd.f32 %v1461_v23, %v3283_v55  ;;  %v1453_v42 = vadd.f32 %v2960_v11, %v1452_v35 }
 0x2e2   :  { %v2140_v7 = vpop.f32.mrf.mxu0 }
 0x2e3   :  { %1701 = vst [vmem:[#allocation10 + $0xd0] sm:$0xff] %v1637_v12  ;;  %v1635_v34 = vadd.f32 %v1453_v42, %v3284_v24  ;;  %v1464_v53 = vadd.f32 %v2140_v7, %v2960_v11 }
 0x2e4   :  { %v1455_v2 = vpop.f32.mrf.mxu0 }
 0x2e5   :  { %1699 = vst [vmem:[#allocation10 + $0xc0] sm:$0xff] %v1635_v34  ;;  %v1638_v47 = vadd.f32 %v1464_v53, %v3285_v59  ;;  %v1456_v6 = vadd.f32 %v2960_v11, %v1455_v2 }
 0x2e6   :  { %v2143_v10 = vpop.f32.mrf.mxu0 }
 0x2e7   :  { %1702 = vst [vmem:[#allocation10 + $0xd8] sm:$0xff] %v1638_v47  ;;  %v1636_v16 = vadd.f32 %v1456_v6, %v3286_v44  ;;  %v1477_v56 = vadd.f32 %v2143_v10, %v2960_v11 }
 0x2e8   :  { %v1468_v49 = vpop.f32.mrf.mxu0 }
 0x2e9   :  { %1700 = vst [vmem:[#allocation10 + $0xc8] sm:$0xff] %v1636_v16  ;;  %v1641_v29 = vadd.f32 %v1477_v56, %v3287_v41  ;;  %v1469_v19 = vadd.f32 %v2960_v11, %v1468_v49 }
 0x2ea   :  { %v2144_v13 = vpop.f32.mrf.mxu0 }
 0x2eb   :  { %1705 = vst [vmem:[#allocation10 + $0xf0] sm:$0xff] %v1641_v29  ;;  %v1639_v38 = vadd.f32 %v1469_v19, %v3288_v43  ;;  %v1480_v0 = vadd.f32 %v2144_v13, %v2960_v11 }
 0x2ec   :  { %v1471_v58 = vpop.f32.mrf.mxu0 }
 0x2ed   :  { %1703 = vst [vmem:[#allocation10 + $0xe0] sm:$0xff] %v1639_v38  ;;  %v1642_v17 = vadd.f32 %v1480_v0, %v3289_v50  ;;  %v1472_v45 = vadd.f32 %v2960_v11, %v1471_v58 }
 0x2ee   :  { %v2147_v15 = vpop.f32.mrf.mxu0 }
 0x2ef   :  { %1706 = vst [vmem:[#allocation10 + $0xf8] sm:$0xff] %v1642_v17  ;;  %v1640_v54 = vadd.f32 %v1472_v45, %v3290_v30  ;;  %v1493_v27 = vadd.f32 %v2147_v15, %v2960_v11 }
 0x2f0   :  { %v1484_v46 = vpop.f32.mrf.mxu0 }
 0x2f1   :  { %1704 = vst [vmem:[#allocation10 + $0xe8] sm:$0xff] %v1640_v54  ;;  %v1645_v18 = vadd.f32 %v1493_v27, %v3291_v40  ;;  %v1485_v8 = vadd.f32 %v2960_v11, %v1484_v46 }
 0x2f2   :  { %v2148_v57 = vpop.f32.mrf.mxu0 }
 0x2f3   :  { %1709 = vst [vmem:[#allocation10 + $0x110] sm:$0xff] %v1645_v18  ;;  %v1643_v48 = vadd.f32 %v1485_v8, %v3292_v60  ;;  %v1496_v61 = vadd.f32 %v2148_v57, %v2960_v11  ;;  %v3307_v8 = vmax.f32 %v3306_v51, 0.0 }
 0x2f4   :  { %v1487_v22 = vpop.f32.mrf.mxu0 }
 0x2f5   :  { %1707 = vst [vmem:[#allocation10 + $0x100] sm:$0xff] %v1643_v48  ;;  %v1646_v52 = vadd.f32 %v1496_v61, %v3293_v9  ;;  %v1488_v14 = vadd.f32 %v2960_v11, %v1487_v22  ;;  %v3309_v61 = vmax.f32 %v3308_v36, 0.0 }
 0x2f6   :  { %v2151_v3 = vpop.f32.mrf.mxu0 }
 0x2f7   :  { %1710 = vst [vmem:[#allocation10 + $0x118] sm:$0xff] %v1646_v52  ;;  %v1644_v23 = vadd.f32 %v1488_v14, %v3294_v62  ;;  %v1509_v35 = vadd.f32 %v2151_v3, %v2960_v11  ;;  %v3311_v14 = vmax.f32 %v3310_v4, 0.0  ;;  %v3334_v4 = vld [vmem:[#allocation27_spill] sm:$0xff] }
 0x2f8   :  { %v1500_v55 = vpop.f32.mrf.mxu0 }
 0x2f9   :  { %1708 = vst [vmem:[#allocation10 + $0x108] sm:$0xff] %v1644_v23  ;;  %v1649_v12 = vadd.f32 %v1509_v35, %v3295_v20  ;;  %v1501_v42 = vadd.f32 %v2960_v11, %v1500_v55  ;;  %v3312_v35 = vld [vmem:[#allocation17_spill] sm:$0xff] }
 0x2fa   :  { %v2152_v7 = vpop.f32.mrf.mxu0  ;;  %v3313_v55 = vmax.f32 %v3312_v35, 0.0 }
 0x2fb   :  { %1713 = vst [vmem:[#allocation10 + $0x130] sm:$0xff] %v1649_v12  ;;  %v1647_v24 = vadd.f32 %v1501_v42, %v3296_v31  ;;  %v1512_v34 = vadd.f32 %v2152_v7, %v2960_v11  ;;  %v3314_v7 = vld [vmem:[#allocation19_spill] sm:$0xff] }
 0x2fc   :  { %v1503_v53 = vpop.f32.mrf.mxu0  ;;  %v3315_v31 = vmax.f32 %v3314_v7, 0.0 }
 0x2fd   :  { %1711 = vst [vmem:[#allocation10 + $0x120] sm:$0xff] %v1647_v24  ;;  %v1650_v2 = vadd.f32 %v1512_v34, %v3297_v32  ;;  %v1504_v59 = vadd.f32 %v2960_v11, %v1503_v53  ;;  %v3316_v32 = vld [vmem:[#allocation22_spill] sm:$0xff] }
 0x2fe   :  { %v2155_v47 = vpop.f32.mrf.mxu0 }
 0x2ff   :  { %1714 = vst [vmem:[#allocation10 + $0x138] sm:$0xff] %v1650_v2  ;;  %v1648_v6 = vadd.f32 %v1504_v59, %v3298_v37  ;;  %v1525_v10 = vadd.f32 %v2155_v47, %v2960_v11  ;;  %v3317_v2 = vmax.f32 %v3316_v32, 0.0 }
 0x300   :  { %v1516_v44 = vpop.f32.mrf.mxu0 }
 0x301   :  { %1712 = vst [vmem:[#allocation10 + $0x128] sm:$0xff] %v1648_v6  ;;  %v1653_v16 = vadd.f32 %v1525_v10, %v3299_v21  ;;  %v1517_v56 = vadd.f32 %v2960_v11, %v1516_v44  ;;  %v3318_v6 = vld [vmem:[#allocation20_spill] sm:$0xff] }
 0x302   :  { %v2156_v49 = vpop.f32.mrf.mxu0  ;;  %v3319_v10 = vmax.f32 %v3318_v6, 0.0 }
 0x303   :  { %1717 = vst [vmem:[#allocation10 + $0x150] sm:$0xff] %v1653_v16  ;;  %v1651_v41 = vadd.f32 %v1517_v56, %v3300_v63  ;;  %v1528_v29 = vadd.f32 %v2156_v49, %v2960_v11  ;;  %v3320_v56 = vld [vmem:[#allocation21_spill] sm:$0xff] }
 0x304   :  { %v1519_v19 = vpop.f32.mrf.mxu0  ;;  %v3321_v49 = vmax.f32 %v3320_v56, 0.0 }
 0x305   :  { %1715 = vst [vmem:[#allocation10 + $0x140] sm:$0xff] %v1651_v41  ;;  %v1654_v13 = vadd.f32 %v1528_v29, %v3301_v28  ;;  %v1520_v43 = vadd.f32 %v2960_v11, %v1519_v19  ;;  %v3322_v19 = vld [vmem:[#allocation23_spill] sm:$0xff] }
 0x306   :  { %v2159_v38 = vpop.f32.mrf.mxu0  ;;  %v3323_v28 = vmax.f32 %v3322_v19, 0.0 }
 0x307   :  { %1718 = vst [vmem:[#allocation10 + $0x158] sm:$0xff] %v1654_v13  ;;  %v1652_v0 = vadd.f32 %v1520_v43, %v3302_v26  ;;  %v1541_v58 = vadd.f32 %v2159_v38, %v2960_v11  ;;  %v3324_v26 = vmax.f32 %v2916_v33, 0.0  ;;  %v3328_v33 = vld [vmem:[#allocation25_spill] sm:$0xff] }
 0x308   :  { %v1532_v50 = vpop.f32.mrf.mxu0 }
 0x309   :  { %1716 = vst [vmem:[#allocation10 + $0x148] sm:$0xff] %v1652_v0  ;;  %v1657_v17 = vadd.f32 %v1541_v58, %v3303_v1  ;;  %v1533_v45 = vadd.f32 %v2960_v11, %v1532_v50  ;;  %v3325_v1 = vld [vmem:[#allocation24_spill] sm:$0xff] }
 0x30a   :  { %v2160_v15 = vpop.f32.mrf.mxu0 }
 0x30b   :  { %1721 = vst [vmem:[#allocation10 + $0x170] sm:$0xff] %v1657_v17  ;;  %v1655_v30 = vadd.f32 %v1533_v45, %v3304_v39  ;;  %v1544_v54 = vadd.f32 %v2160_v15, %v2960_v11  ;;  %v3326_v17 = vmax.f32 %v3325_v1, 0.0 }
 0x30c   :  { %v1535_v27 = vpop.f32.mrf.mxu0 }
 0x30d   :  { %1719 = vst [vmem:[#allocation10 + $0x160] sm:$0xff] %v1655_v30  ;;  %v1658_v46 = vadd.f32 %v1544_v54, %v3305_v25  ;;  %v1536_v40 = vadd.f32 %v2960_v11, %v1535_v27  ;;  %v3327_v30 = vmax.f32 %v2913_v5, 0.0  ;;  %v3332_v5 = vld [vmem:[#allocation26_spill] sm:$0xff] }
 0x30e   :  { %v2163_v18 = vpop.f32.mrf.mxu0 }
 0x30f   :  { %1722 = vst [vmem:[#allocation10 + $0x178] sm:$0xff] %v1658_v46  ;;  %v1656_v57 = vadd.f32 %v1536_v40, %v3307_v8  ;;  %v1557_v60 = vadd.f32 %v2163_v18, %v2960_v11  ;;  %v3329_v46 = vmax.f32 %v3328_v33, 0.0  ;;  %v3330_v8 = vld [vmem:[#allocation28_spill] sm:$0xff] }
 0x310   :  { %v1548_v48 = vpop.f32.mrf.mxu0 }
 0x311   :  { %1720 = vst [vmem:[#allocation10 + $0x168] sm:$0xff] %v1656_v57  ;;  %v1661_v22 = vadd.f32 %v1557_v60, %v3309_v61  ;;  %v1549_v9 = vadd.f32 %v2960_v11, %v1548_v48  ;;  %v3331_v57 = vmax.f32 %v3330_v8, 0.0  ;;  %v3333_v61 = vmax.f32 %v3332_v5, 0.0 }
 0x312   :  { %v2164_v52 = vpop.f32.mrf.mxu0 }
 0x313   :  { %1725 = vst [vmem:[#allocation10 + $0x190] sm:$0xff] %v1661_v22  ;;  %v1659_v3 = vadd.f32 %v1549_v9, %v3311_v14  ;;  %v1560_v62 = vadd.f32 %v2164_v52, %v2960_v11  ;;  %v3335_v14 = vmax.f32 %v3334_v4, 0.0 }
 0x314   :  { %v1551_v23 = vpop.f32.mrf.mxu0 }
 0x315   :  { %1723 = vst [vmem:[#allocation10 + $0x180] sm:$0xff] %v1659_v3  ;;  %v1662_v20 = vadd.f32 %v1560_v62, %v3313_v55  ;;  %v1552_v12 = vadd.f32 %v2960_v11, %v1551_v23  ;;  %v3336_v23 = vld [vmem:[#allocation29_spill] sm:$0xff] }
 0x316   :  { %v2167_v42 = vpop.f32.mrf.mxu0  ;;  %v3337_v35 = vmax.f32 %v3336_v23, 0.0 }
 0x317   :  { %1726 = vst [vmem:[#allocation10 + $0x198] sm:$0xff] %v1662_v20  ;;  %v1660_v24 = vadd.f32 %v1552_v12, %v3315_v31  ;;  %v1573_v34 = vadd.f32 %v2167_v42, %v2960_v11 }
 0x318   :  { %v1564_v53 = vpop.f32.mrf.mxu0 }
 0x319   :  { %1724 = vst [vmem:[#allocation10 + $0x188] sm:$0xff] %v1660_v24  ;;  %v1665_v59 = vadd.f32 %v1573_v34, %v3317_v2  ;;  %v1565_v47 = vadd.f32 %v2960_v11, %v1564_v53 }
 0x31a   :  { %v2168_v37 = vpop.f32.mrf.mxu0 }
 0x31b   :  { %1729 = vst [vmem:[#allocation10 + $0x1b0] sm:$0xff] %v1665_v59  ;;  %v1663_v44 = vadd.f32 %v1565_v47, %v3319_v10  ;;  %v1576_v21 = vadd.f32 %v2168_v37, %v2960_v11 }
 0x31c   :  { %v1567_v16 = vpop.f32.mrf.mxu0 }
 0x31d   :  { %1727 = vst [vmem:[#allocation10 + $0x1a0] sm:$0xff] %v1663_v44  ;;  %v1666_v63 = vadd.f32 %v1576_v21, %v3321_v49  ;;  %v1568_v41 = vadd.f32 %v2960_v11, %v1567_v16 }
 0x31e   :  { %v2171_v29 = vpop.f32.mrf.mxu0 }
 0x31f   :  { %1730 = vst [vmem:[#allocation10 + $0x1b8] sm:$0xff] %v1666_v63  ;;  %v1664_v13 = vadd.f32 %v1568_v41, %v3323_v28  ;;  %v1589_v43 = vadd.f32 %v2171_v29, %v2960_v11 }
 0x320   :  { %v1580_v38 = vpop.f32.mrf.mxu0 }
 0x321   :  { %1728 = vst [vmem:[#allocation10 + $0x1a8] sm:$0xff] %v1664_v13  ;;  %v1669_v0 = vadd.f32 %v1589_v43, %v3324_v26  ;;  %v1581_v58 = vadd.f32 %v2960_v11, %v1580_v38 }
 0x322   :  { %v2172_v50 = vpop.f32.mrf.mxu0 }
 0x323   :  { %1733 = vst [vmem:[#allocation10 + $0x1d0] sm:$0xff] %v1669_v0  ;;  %v1667_v45 = vadd.f32 %v1581_v58, %v3326_v17  ;;  %v1592_v15 = vadd.f32 %v2172_v50, %v2960_v11 }
 0x324   :  { %v1583_v39 = vpop.f32.mrf.mxu0 }
 0x325   :  { %1731 = vst [vmem:[#allocation10 + $0x1c0] sm:$0xff] %v1667_v45  ;;  %v1670_v54 = vadd.f32 %v1592_v15, %v3327_v30  ;;  %v1584_v27 = vadd.f32 %v2960_v11, %v1583_v39 }
 0x326   :  { %v2175_v25 = vpop.f32.mrf.mxu0 }
 0x327   :  { %1734 = vst [vmem:[#allocation10 + $0x1d8] sm:$0xff] %v1670_v54  ;;  %v1668_v40 = vadd.f32 %v1584_v27, %v3329_v46  ;;  %v1605_v18 = vadd.f32 %v2175_v25, %v2960_v11 }
 0x328   :  { %v1596_v51 = vpop.f32.mrf.mxu0 }
 0x329   :  { %1732 = vst [vmem:[#allocation10 + $0x1c8] sm:$0xff] %v1668_v40  ;;  %v1673_v60 = vadd.f32 %v1605_v18, %v3331_v57  ;;  %v1597_v48 = vadd.f32 %v2960_v11, %v1596_v51 }
 0x32a   :  { %v2176_v36 = vpop.f32.mrf.mxu0 }
 0x32b   :  { %1737 = vst [vmem:[#allocation10 + $0x1f0] sm:$0xff] %v1673_v60  ;;  %v1671_v22 = vadd.f32 %v1597_v48, %v3333_v61  ;;  %v1608_v9 = vadd.f32 %v2176_v36, %v2960_v11 }
 0x32c   :  { %v1599_v52 = vpop.f32.mrf.mxu0 }
 0x32d   :  { %1735 = vst [vmem:[#allocation10 + $0x1e0] sm:$0xff] %v1671_v22  ;;  %v1674_v3 = vadd.f32 %v1608_v9, %v3335_v14  ;;  %v1600_v62 = vadd.f32 %v2960_v11, %v1599_v52 }
 0x32f   :  { %1738 = vst [vmem:[#allocation10 + $0x1f8] sm:$0xff] %v1674_v3  ;;  %v1672_v55 = vadd.f32 %v1600_v62, %v3337_v35 }
 0x331   :  { %1736 = vst [vmem:[#allocation10 + $0x1e8] sm:$0xff] %v1672_v55 }
 0x332   :  { %2349 = shalt.err (!%p2346_p10)
}
 0x333   :  { %s2373_s25 = smov 128   ;;  %s2374_s26 = smov 8  }
 0x334   :  { %1750 = dma.vmem_to_hbm [thread:$0]  %s1745_s23, 8192, %s3164_s7, [#allocation4], %s2373_s25, %s2373_s25, %s2374_s26  }
 0x335   :  { %2364 = dma.done.wait [#allocation4], 8192  }
 0x336   :  { %2365 = vsyncadd [#allocation4], 4294959104 }
 0x337   :  { %1754 = vsyncpa [#allocation3], 1 }
 0x338   :  { %1755 = vsyncpa [#allocation6], 1 }
 0x339   :  { %1756 = vsyncpa [#allocation9], 1 }
 0x33a   :  { %1757 = vsyncpa [#allocation4], 1 }

</bundles_post_ra>
